<compile_context>
chip_gen: v6e
topology: v6e:2x2x1
jax: 0.10.0
libtpu: 0.0.40
codegen_flags: <defaults>
</compile_context>

<pallas_src>
import functools

import jax
import jax.numpy as jnp
from jax.experimental import pallas as pl
from jax.experimental.pallas import tpu as pltpu

_EPS = 1e-5
_SLOPE = 0.2
_VMEM = pl.BlockSpec(memory_space=pltpu.MemorySpace.VMEM)


# ---------------------------------------------------------------------------
# Kernel A: conv (lane-dense matmul) + LeakyReLU.  M-tiled, no BatchNorm.
#   p_ref: (K, TM)   bf16  one M-tile of the transposed im2col patches
#   w_ref: (Cout, K) bf16  full weight matrix
#   o_ref: (Cout, TM) bf16
# ---------------------------------------------------------------------------
def _conv_lrelu_kernel(p_ref, w_ref, o_ref):
    y = jnp.dot(w_ref[...], p_ref[...], preferred_element_type=jnp.float32)
    y = jnp.where(y >= 0.0, y, _SLOPE * y)          # epilogue in f32
    o_ref[...] = y.astype(o_ref.dtype)


# ---------------------------------------------------------------------------
# Kernel B: conv + training-mode BatchNorm2d + LeakyReLU, whole (Cout, M)
# block resident so the BN statistics are exact over all N*Ho*Wo positions
# (biased variance, eps=1e-5, matching nn.BatchNorm2d in training mode).
# Optionally fuses the final 1-output head conv (conv5) + sigmoid so the tiny
# (N,1024)@(1024,1) matmul does not pay a separate pallas_call launch.
#   p_ref: (K, M) bf16, w_ref: (Cout, K) bf16, g_ref/b_ref: (Cout, 1) f32
#   fuse_head=False: rest = (o_ref,)                o_ref: (Cout, M) bf16
#   fuse_head=True : rest = (w5_ref, sel_ref, o5_ref)
#       w5_ref: (Cout, M) f32  conv5 weights tiled over the batch
#       sel_ref: (M, N)  f32   per-sample column selector
#       o5_ref: (1, N)   f32   sigmoid(conv5) output
# ---------------------------------------------------------------------------
def _conv_bn_lrelu_kernel(p_ref, w_ref, g_ref, b_ref, *rest, fuse_head):
    if fuse_head:
        w5_ref, sel_ref, o5_ref = rest
    else:
        (o_ref,) = rest

    y = jnp.dot(w_ref[...], p_ref[...], preferred_element_type=jnp.float32)
    mean = jnp.mean(y, axis=1, keepdims=True)                  # lane reduce
    var = jnp.mean(jnp.square(y - mean), axis=1, keepdims=True)
    y = (y - mean) * jax.lax.rsqrt(var + _EPS)
    y = y * g_ref[...] + b_ref[...]                            # (Cout,1) bcast
    y = jnp.where(y >= 0.0, y, _SLOPE * y)

    if fuse_head:
        # conv5 (4x4, stride 1, pad 0):  out[n] = sum_{c,s} y[c, n*S+s]*w5[c,s]
        z = y * w5_ref[...]                                    # (Cout, M)
        t = jnp.sum(z, axis=0, keepdims=True)                  # (1, M)
        o5 = jnp.dot(t, sel_ref[...], preferred_element_type=jnp.float32)
        o5_ref[...] = 1.0 / (1.0 + jnp.exp(-o5))               # sigmoid
    else:
        o_ref[...] = y.astype(o_ref.dtype)


# ---------------------------------------------------------------------------
# Wrapper glue: transposed im2col (K, M) in bf16, channel-major activations.
# ---------------------------------------------------------------------------
def _patches_t(a_cm, n, h, w, cin, k, stride, pad):
    """a_cm: (Cin, N*H*W) channel-major activation -> (K, M) patches^T."""
    x = a_cm.reshape(cin, n, h, w)
    xp = jnp.pad(x, ((0, 0), (0, 0), (pad, pad), (pad, pad)))
    ho = (h + 2 * pad - k) // stride + 1
    wo = (w + 2 * pad - k) // stride + 1
    taps = [xp[:, :, dy:dy + stride * ho:stride, dx:dx + stride * wo:stride]
            for dy in range(k) for dx in range(k)]
    p = jnp.stack(taps, axis=0)                    # (k*k, Cin, N, Ho, Wo)
    return p.reshape(k * k * cin, n * ho * wo), ho, wo


def _w_mat(w_oihw):
    """(Cout, Cin, KH, KW) -> (Cout, KH*KW*Cin), tap-major / channel-minor."""
    cout, cin, kh, kw = w_oihw.shape
    return jnp.transpose(w_oihw, (0, 2, 3, 1)).reshape(cout, kh * kw * cin)


def _conv_lrelu_tiled(a_cm, shape_nhw, w_oihw, *, stride, pad):
    """conv + LeakyReLU (no BN), M-tiled grid with parallel semantics."""
    cout, cin, kh, _ = w_oihw.shape
    n, h, w = shape_nhw
    p, ho, wo = _patches_t(a_cm, n, h, w, cin, kh, stride, pad)
    p = p.astype(jnp.bfloat16)
    wm = _w_mat(w_oihw).astype(jnp.bfloat16)
    k, m = p.shape
    tm = next((t for t in (512, 256, 128) if m % t == 0), m)

    out = pl.pallas_call(
        _conv_lrelu_kernel,
        out_shape=jax.ShapeDtypeStruct((cout, m), jnp.bfloat16),
        grid=(m // tm,),
        in_specs=[pl.BlockSpec((k, tm), lambda i: (0, i)),
                  pl.BlockSpec((cout, k), lambda i: (0, 0))],
        out_specs=pl.BlockSpec((cout, tm), lambda i: (0, i)),
        compiler_params=pltpu.CompilerParams(
            dimension_semantics=("parallel",)),
    )(p, wm)
    return out, (n, ho, wo)


def _conv_bn_lrelu(a_cm, shape_nhw, w_oihw, gamma, beta, *, stride, pad,
                   head_w=None):
    """conv + BN + LeakyReLU; optionally fuses conv5+sigmoid (head_w)."""
    cout, cin, kh, _ = w_oihw.shape
    n, h, w = shape_nhw
    p, ho, wo = _patches_t(a_cm, n, h, w, cin, kh, stride, pad)
    p = p.astype(jnp.bfloat16)
    wm = _w_mat(w_oihw).astype(jnp.bfloat16)
    m = n * ho * wo
    g = gamma.reshape(cout, 1).astype(jnp.float32)
    b = beta.reshape(cout, 1).astype(jnp.float32)

    if head_w is None:
        out = pl.pallas_call(
            functools.partial(_conv_bn_lrelu_kernel, fuse_head=False),
            out_shape=jax.ShapeDtypeStruct((cout, m), jnp.bfloat16),
            in_specs=[_VMEM] * 4,
            out_specs=_VMEM,
        )(p, wm, g, b)
        return out, (n, ho, wo)

    # Fused head: conv5 is 4x4/s1/p0 over the (ho, wo) = (4, 4) feature map.
    s = ho * wo
    w5m = head_w.reshape(cout, s).astype(jnp.float32)          # (Cout, 16)
    w5_tiled = jnp.tile(w5m, (1, n))                           # (Cout, N*16)
    sel = jnp.repeat(jnp.eye(n, dtype=jnp.float32), s, axis=0)  # (N*16, N)
    o5 = pl.pallas_call(
        functools.partial(_conv_bn_lrelu_kernel, fuse_head=True),
        out_shape=jax.ShapeDtypeStruct((1, n), jnp.float32),
        in_specs=[_VMEM] * 6,
        out_specs=_VMEM,
    )(p, wm, g, b, w5_tiled, sel)
    return o5, None


# ---------------------------------------------------------------------------
# Discriminator parameters + forward
# ---------------------------------------------------------------------------
def init_discriminator_params(key, d_feature_num):
    df = d_feature_num
    ks = jax.random.split(key, 9)

    def conv_w(k, cout, cin):
        return 0.02 * jax.random.normal(k, (cout, cin, 4, 4), jnp.float32)

    return {
        "w1": conv_w(ks[0], df, 3),
        "w2": conv_w(ks[1], df * 2, df),
        "g2": 1.0 + 0.1 * jax.random.normal(ks[2], (df * 2,), jnp.float32),
        "b2": 0.1 * jax.random.normal(ks[3], (df * 2,), jnp.float32),
        "w3": conv_w(ks[4], df * 4, df * 2),
        "g3": jnp.ones((df * 4,), jnp.float32),
        "b3": jnp.zeros((df * 4,), jnp.float32),
        "w4": conv_w(ks[5], df * 8, df * 4),
        "g4": 1.0 + 0.1 * jax.random.normal(ks[6], (df * 8,), jnp.float32),
        "b4": 0.1 * jax.random.normal(ks[7], (df * 8,), jnp.float32),
        "w5": conv_w(ks[8], 1, df * 8),
    }


@jax.jit
def discriminator_forward(params, x_nchw):
    n, c, h, w = x_nchw.shape
    # NCHW -> channel-major (C, N*H*W) bf16; activations keep this lane-dense
    # layout between all layers (flattened N*Ho*Wo on the lane axis).
    a = jnp.transpose(x_nchw, (1, 0, 2, 3)).reshape(c, n * h * w)
    a = a.astype(jnp.bfloat16)

    # conv1 + leaky_relu (no BN) — M-tiled, parallel grid.
    a, shp = _conv_lrelu_tiled(a, (n, h, w), params["w1"], stride=2, pad=1)
    # conv2 + bn2 + leaky_relu
    a, shp = _conv_bn_lrelu(a, shp, params["w2"], params["g2"], params["b2"],
                            stride=2, pad=1)
    # conv3 + bn3 + leaky_relu
    a, shp = _conv_bn_lrelu(a, shp, params["w3"], params["g3"], params["b3"],
                            stride=2, pad=1)
    # conv4 + bn4 + leaky_relu, with conv5 + sigmoid fused into the epilogue.
    o5, _ = _conv_bn_lrelu(a, shp, params["w4"], params["g4"], params["b4"],
                           stride=2, pad=1, head_w=params["w5"])
    # o5: (1, N) -> (N, 1, 1, 1) to match the PyTorch output layout.
    return jnp.transpose(o5).reshape(n, 1, 1, 1)


if __name__ == "__main__":
    key = jax.random.PRNGKey(0)
    k_param, k_x = jax.random.split(key)

    d_feature_num = 8          # small feature count
    batch = 2
    # DCGAN discriminator requires 64x64 input for the 4x4/s1/p0 final conv.
    x = jax.random.normal(k_x, (batch, 3, 64, 64), jnp.float32)

    params = init_discriminator_params(k_param, d_feature_num)
    out = discriminator_forward(params, x)
    out = jax.block_until_ready(out)

    assert out.shape == (batch, 1, 1, 1), out.shape
    assert bool(jnp.all(jnp.isfinite(out)))
    assert bool(jnp.all((out >= 0.0) & (out <= 1.0)))
    print("KERNEL_OK")
</pallas_src>

<mosaic_0001>
module attributes {stable_mosaic.version = 11 : i64} {
  func.func @_conv_lrelu_kernel(%arg0: i32, %arg1: memref<48x512xbf16, #tpu.memory_space<vmem>>, %arg2: memref<8x48xbf16, #tpu.memory_space<vmem>>, %arg3: memref<8x512xbf16, #tpu.memory_space<vmem>>) attributes {dimension_semantics = [#tpu.dimension_semantics<parallel>], iteration_bounds = array<i64: 4>, scalar_prefetch = 0 : i64, scratch_operands = 0 : i64, tpu.core_type = #tpu.core_type<tc>, window_params = [{transform_indices = @transform_0, window_bounds = array<i64: 48, 512>}, {pipeline_mode = #tpu.pipeline_mode<synchronous>, transform_indices = @transform_1, window_bounds = array<i64: 8, 48>}, {transform_indices = @transform_2, window_bounds = array<i64: 8, 512>}]} {
    %c0 = arith.constant 0 : index
    %c0_0 = arith.constant 0 : index
    %0 = vector.load %arg2[%c0, %c0_0] : memref<8x48xbf16, #tpu.memory_space<vmem>>, vector<8x48xbf16>
    %c0_1 = arith.constant 0 : index
    %c0_2 = arith.constant 0 : index
    %1 = vector.load %arg1[%c0_1, %c0_2] : memref<48x512xbf16, #tpu.memory_space<vmem>>, vector<48x512xbf16>
    %cst = arith.constant dense<0.000000e+00> : vector<8x512xf32>
    %2 = tpu.matmul %0, %1, %cst {dimension_numbers = #tpu.dot_dimension_numbers<[1], [0], [0], [1], [0, 0, 1, 1], [], []>} : vector<8x48xbf16>, vector<48x512xbf16>, vector<8x512xf32> -> vector<8x512xf32>
    %cst_3 = arith.constant 0.000000e+00 : f32
    %3 = vector.broadcast %cst_3 : f32 to vector<8x512xf32>
    %4 = arith.cmpf oge, %2, %3 : vector<8x512xf32>
    %cst_4 = arith.constant 2.000000e-01 : f32
    %5 = vector.broadcast %cst_4 : f32 to vector<8x512xf32>
    %6 = arith.mulf %5, %2 : vector<8x512xf32>
    %7 = arith.select %4, %2, %6 : vector<8x512xi1>, vector<8x512xf32>
    %8 = arith.truncf %7 : vector<8x512xf32> to vector<8x512xbf16>
    %c0_5 = arith.constant 0 : index
    %c0_6 = arith.constant 0 : index
    %9 = vector.load %arg3[%c0_5, %c0_6] : memref<8x512xbf16, #tpu.memory_space<vmem>>, vector<8x512xbf16>
    tpu.vector_store %arg3[%c0_5, %c0_6], %8 {strides = array<i32>} : memref<8x512xbf16, #tpu.memory_space<vmem>>, vector<8x512xbf16>,
    return
  }
  func.func @transform_0(%arg0: i32) -> (i32, i32) {
    %c0_i32 = arith.constant 0 : i32
    %c0_i32_0 = arith.constant 0 : i32
    return %c0_i32, %arg0 : i32, i32
  }
  func.func @transform_1(%arg0: i32) -> (i32, i32) {
    %c0_i32 = arith.constant 0 : i32
    %c0_i32_0 = arith.constant 0 : i32
    %c0_i32_1 = arith.constant 0 : i32
    return %c0_i32, %c0_i32_0 : i32, i32
  }
  func.func @transform_2(%arg0: i32) -> (i32, i32) {
    %c0_i32 = arith.constant 0 : i32
    %c0_i32_0 = arith.constant 0 : i32
    return %c0_i32, %arg0 : i32, i32
  }
}

module attributes {stable_mosaic.version = 11 : i64} {
  func.func @_conv_bn_lrelu_kernel(%arg0: memref<128x512xbf16, #tpu.memory_space<vmem>>, %arg1: memref<16x128xbf16, #tpu.memory_space<vmem>>, %arg2: memref<16x1xf32, #tpu.memory_space<vmem>>, %arg3: memref<16x1xf32, #tpu.memory_space<vmem>>, %arg4: memref<16x512xbf16, #tpu.memory_space<vmem>>) attributes {dimension_semantics = [], scalar_prefetch = 0 : i64, scratch_operands = 0 : i64, tpu.core_type = #tpu.core_type<tc>} {
    %c0 = arith.constant 0 : index
    %c0_0 = arith.constant 0 : index
    %0 = vector.load %arg1[%c0, %c0_0] : memref<16x128xbf16, #tpu.memory_space<vmem>>, vector<16x128xbf16>
    %c0_1 = arith.constant 0 : index
    %c0_2 = arith.constant 0 : index
    %1 = vector.load %arg0[%c0_1, %c0_2] : memref<128x512xbf16, #tpu.memory_space<vmem>>, vector<128x512xbf16>
    %cst = arith.constant dense<0.000000e+00> : vector<16x512xf32>
    %2 = tpu.matmul %0, %1, %cst {dimension_numbers = #tpu.dot_dimension_numbers<[1], [0], [0], [1], [0, 0, 1, 1], [], []>} : vector<16x128xbf16>, vector<128x512xbf16>, vector<16x512xf32> -> vector<16x512xf32>
    %cst_3 = arith.constant dense<0.000000e+00> : vector<16xf32>
    %3 = vector.multi_reduction <add>, %2, %cst_3 [1] : vector<16x512xf32> to vector<16xf32>
    %4 = vector.shape_cast %3 : vector<16xf32> to vector<16x1xf32>
    %cst_4 = arith.constant 5.120000e+02 : f32
    %5 = vector.broadcast %cst_4 : f32 to vector<16x1xf32>
    %6 = arith.divf %4, %5 : vector<16x1xf32>
    %7 = vector.broadcast %6 : vector<16x1xf32> to vector<16x512xf32>
    %8 = arith.subf %2, %7 : vector<16x512xf32>
    %9 = arith.mulf %8, %8 : vector<16x512xf32>
    %cst_5 = arith.constant dense<0.000000e+00> : vector<16xf32>
    %10 = vector.multi_reduction <add>, %9, %cst_5 [1] : vector<16x512xf32> to vector<16xf32>
    %11 = vector.shape_cast %10 : vector<16xf32> to vector<16x1xf32>
    %cst_6 = arith.constant 5.120000e+02 : f32
    %12 = vector.broadcast %cst_6 : f32 to vector<16x1xf32>
    %13 = arith.divf %11, %12 : vector<16x1xf32>
    %14 = vector.broadcast %6 : vector<16x1xf32> to vector<16x512xf32>
    %15 = arith.subf %2, %14 : vector<16x512xf32>
    %cst_7 = arith.constant 9.99999974E-6 : f32
    %16 = vector.broadcast %cst_7 : f32 to vector<16x1xf32>
    %17 = arith.addf %13, %16 : vector<16x1xf32>
    %18 = math.rsqrt %17 : vector<16x1xf32>
    %19 = vector.broadcast %18 : vector<16x1xf32> to vector<16x512xf32>
    %20 = arith.mulf %15, %19 : vector<16x512xf32>
    %c0_8 = arith.constant 0 : index
    %c0_9 = arith.constant 0 : index
    %21 = vector.load %arg2[%c0_8, %c0_9] : memref<16x1xf32, #tpu.memory_space<vmem>>, vector<16x1xf32>
    %22 = vector.broadcast %21 : vector<16x1xf32> to vector<16x512xf32>
    %23 = arith.mulf %20, %22 : vector<16x512xf32>
    %c0_10 = arith.constant 0 : index
    %c0_11 = arith.constant 0 : index
    %24 = vector.load %arg3[%c0_10, %c0_11] : memref<16x1xf32, #tpu.memory_space<vmem>>, vector<16x1xf32>
    %25 = vector.broadcast %24 : vector<16x1xf32> to vector<16x512xf32>
    %26 = arith.addf %23, %25 : vector<16x512xf32>
    %cst_12 = arith.constant 0.000000e+00 : f32
    %27 = vector.broadcast %cst_12 : f32 to vector<16x512xf32>
    %28 = arith.cmpf oge, %26, %27 : vector<16x512xf32>
    %cst_13 = arith.constant 2.000000e-01 : f32
    %29 = vector.broadcast %cst_13 : f32 to vector<16x512xf32>
    %30 = arith.mulf %29, %26 : vector<16x512xf32>
    %31 = arith.select %28, %26, %30 : vector<16x512xi1>, vector<16x512xf32>
    %32 = arith.truncf %31 : vector<16x512xf32> to vector<16x512xbf16>
    %c0_14 = arith.constant 0 : index
    %c0_15 = arith.constant 0 : index
    %33 = vector.load %arg4[%c0_14, %c0_15] : memref<16x512xbf16, #tpu.memory_space<vmem>>, vector<16x512xbf16>
    tpu.vector_store %arg4[%c0_14, %c0_15], %32 {strides = array<i32>} : memref<16x512xbf16, #tpu.memory_space<vmem>>, vector<16x512xbf16>,
    return
  }
}

module attributes {stable_mosaic.version = 11 : i64} {
  func.func @_conv_bn_lrelu_kernel(%arg0: memref<256x128xbf16, #tpu.memory_space<vmem>>, %arg1: memref<32x256xbf16, #tpu.memory_space<vmem>>, %arg2: memref<32x1xf32, #tpu.memory_space<vmem>>, %arg3: memref<32x1xf32, #tpu.memory_space<vmem>>, %arg4: memref<32x128xbf16, #tpu.memory_space<vmem>>) attributes {dimension_semantics = [], scalar_prefetch = 0 : i64, scratch_operands = 0 : i64, tpu.core_type = #tpu.core_type<tc>} {
    %c0 = arith.constant 0 : index
    %c0_0 = arith.constant 0 : index
    %0 = vector.load %arg1[%c0, %c0_0] : memref<32x256xbf16, #tpu.memory_space<vmem>>, vector<32x256xbf16>
    %c0_1 = arith.constant 0 : index
    %c0_2 = arith.constant 0 : index
    %1 = vector.load %arg0[%c0_1, %c0_2] : memref<256x128xbf16, #tpu.memory_space<vmem>>, vector<256x128xbf16>
    %cst = arith.constant dense<0.000000e+00> : vector<32x128xf32>
    %2 = tpu.matmul %0, %1, %cst {dimension_numbers = #tpu.dot_dimension_numbers<[1], [0], [0], [1], [0, 0, 1, 1], [], []>} : vector<32x256xbf16>, vector<256x128xbf16>, vector<32x128xf32> -> vector<32x128xf32>
    %cst_3 = arith.constant dense<0.000000e+00> : vector<32xf32>
    %3 = vector.multi_reduction <add>, %2, %cst_3 [1] : vector<32x128xf32> to vector<32xf32>
    %4 = vector.shape_cast %3 : vector<32xf32> to vector<32x1xf32>
    %cst_4 = arith.constant 1.280000e+02 : f32
    %5 = vector.broadcast %cst_4 : f32 to vector<32x1xf32>
    %6 = arith.divf %4, %5 : vector<32x1xf32>
    %7 = vector.broadcast %6 : vector<32x1xf32> to vector<32x128xf32>
    %8 = arith.subf %2, %7 : vector<32x128xf32>
    %9 = arith.mulf %8, %8 : vector<32x128xf32>
    %cst_5 = arith.constant dense<0.000000e+00> : vector<32xf32>
    %10 = vector.multi_reduction <add>, %9, %cst_5 [1] : vector<32x128xf32> to vector<32xf32>
    %11 = vector.shape_cast %10 : vector<32xf32> to vector<32x1xf32>
    %cst_6 = arith.constant 1.280000e+02 : f32
    %12 = vector.broadcast %cst_6 : f32 to vector<32x1xf32>
    %13 = arith.divf %11, %12 : vector<32x1xf32>
    %14 = vector.broadcast %6 : vector<32x1xf32> to vector<32x128xf32>
    %15 = arith.subf %2, %14 : vector<32x128xf32>
    %cst_7 = arith.constant 9.99999974E-6 : f32
    %16 = vector.broadcast %cst_7 : f32 to vector<32x1xf32>
    %17 = arith.addf %13, %16 : vector<32x1xf32>
    %18 = math.rsqrt %17 : vector<32x1xf32>
    %19 = vector.broadcast %18 : vector<32x1xf32> to vector<32x128xf32>
    %20 = arith.mulf %15, %19 : vector<32x128xf32>
    %c0_8 = arith.constant 0 : index
    %c0_9 = arith.constant 0 : index
    %21 = vector.load %arg2[%c0_8, %c0_9] : memref<32x1xf32, #tpu.memory_space<vmem>>, vector<32x1xf32>
    %22 = vector.broadcast %21 : vector<32x1xf32> to vector<32x128xf32>
    %23 = arith.mulf %20, %22 : vector<32x128xf32>
    %c0_10 = arith.constant 0 : index
    %c0_11 = arith.constant 0 : index
    %24 = vector.load %arg3[%c0_10, %c0_11] : memref<32x1xf32, #tpu.memory_space<vmem>>, vector<32x1xf32>
    %25 = vector.broadcast %24 : vector<32x1xf32> to vector<32x128xf32>
    %26 = arith.addf %23, %25 : vector<32x128xf32>
    %cst_12 = arith.constant 0.000000e+00 : f32
    %27 = vector.broadcast %cst_12 : f32 to vector<32x128xf32>
    %28 = arith.cmpf oge, %26, %27 : vector<32x128xf32>
    %cst_13 = arith.constant 2.000000e-01 : f32
    %29 = vector.broadcast %cst_13 : f32 to vector<32x128xf32>
    %30 = arith.mulf %29, %26 : vector<32x128xf32>
    %31 = arith.select %28, %26, %30 : vector<32x128xi1>, vector<32x128xf32>
    %32 = arith.truncf %31 : vector<32x128xf32> to vector<32x128xbf16>
    %c0_14 = arith.constant 0 : index
    %c0_15 = arith.constant 0 : index
    %33 = vector.load %arg4[%c0_14, %c0_15] : memref<32x128xbf16, #tpu.memory_space<vmem>>, vector<32x128xbf16>
    tpu.vector_store %arg4[%c0_14, %c0_15], %32 {strides = array<i32>} : memref<32x128xbf16, #tpu.memory_space<vmem>>, vector<32x128xbf16>,
    return
  }
}

module attributes {stable_mosaic.version = 11 : i64} {
  func.func @_conv_bn_lrelu_kernel(%arg0: memref<512x32xbf16, #tpu.memory_space<vmem>>, %arg1: memref<64x512xbf16, #tpu.memory_space<vmem>>, %arg2: memref<64x1xf32, #tpu.memory_space<vmem>>, %arg3: memref<64x1xf32, #tpu.memory_space<vmem>>, %arg4: memref<64x32xf32, #tpu.memory_space<vmem>>, %arg5: memref<32x2xf32, #tpu.memory_space<vmem>>, %arg6: memref<1x2xf32, #tpu.memory_space<vmem>>) attributes {dimension_semantics = [], scalar_prefetch = 0 : i64, scratch_operands = 0 : i64, tpu.core_type = #tpu.core_type<tc>} {
    %c0 = arith.constant 0 : index
    %c0_0 = arith.constant 0 : index
    %0 = vector.load %arg1[%c0, %c0_0] : memref<64x512xbf16, #tpu.memory_space<vmem>>, vector<64x512xbf16>
    %c0_1 = arith.constant 0 : index
    %c0_2 = arith.constant 0 : index
    %1 = vector.load %arg0[%c0_1, %c0_2] : memref<512x32xbf16, #tpu.memory_space<vmem>>, vector<512x32xbf16>
    %cst = arith.constant dense<0.000000e+00> : vector<64x32xf32>
    %2 = tpu.matmul %0, %1, %cst {dimension_numbers = #tpu.dot_dimension_numbers<[1], [0], [0], [1], [0, 0, 1, 1], [], []>} : vector<64x512xbf16>, vector<512x32xbf16>, vector<64x32xf32> -> vector<64x32xf32>
    %cst_3 = arith.constant dense<0.000000e+00> : vector<64xf32>
    %3 = vector.multi_reduction <add>, %2, %cst_3 [1] : vector<64x32xf32> to vector<64xf32>
    %4 = vector.shape_cast %3 : vector<64xf32> to vector<64x1xf32>
    %cst_4 = arith.constant 3.200000e+01 : f32
    %5 = vector.broadcast %cst_4 : f32 to vector<64x1xf32>
    %6 = arith.divf %4, %5 : vector<64x1xf32>
    %7 = vector.broadcast %6 : vector<64x1xf32> to vector<64x32xf32>
    %8 = arith.subf %2, %7 : vector<64x32xf32>
    %9 = arith.mulf %8, %8 : vector<64x32xf32>
    %cst_5 = arith.constant dense<0.000000e+00> : vector<64xf32>
    %10 = vector.multi_reduction <add>, %9, %cst_5 [1] : vector<64x32xf32> to vector<64xf32>
    %11 = vector.shape_cast %10 : vector<64xf32> to vector<64x1xf32>
    %cst_6 = arith.constant 3.200000e+01 : f32
    %12 = vector.broadcast %cst_6 : f32 to vector<64x1xf32>
    %13 = arith.divf %11, %12 : vector<64x1xf32>
    %14 = vector.broadcast %6 : vector<64x1xf32> to vector<64x32xf32>
    %15 = arith.subf %2, %14 : vector<64x32xf32>
    %cst_7 = arith.constant 9.99999974E-6 : f32
    %16 = vector.broadcast %cst_7 : f32 to vector<64x1xf32>
    %17 = arith.addf %13, %16 : vector<64x1xf32>
    %18 = math.rsqrt %17 : vector<64x1xf32>
    %19 = vector.broadcast %18 : vector<64x1xf32> to vector<64x32xf32>
    %20 = arith.mulf %15, %19 : vector<64x32xf32>
    %c0_8 = arith.constant 0 : index
    %c0_9 = arith.constant 0 : index
    %21 = vector.load %arg2[%c0_8, %c0_9] : memref<64x1xf32, #tpu.memory_space<vmem>>, vector<64x1xf32>
    %22 = vector.broadcast %21 : vector<64x1xf32> to vector<64x32xf32>
    %23 = arith.mulf %20, %22 : vector<64x32xf32>
    %c0_10 = arith.constant 0 : index
    %c0_11 = arith.constant 0 : index
    %24 = vector.load %arg3[%c0_10, %c0_11] : memref<64x1xf32, #tpu.memory_space<vmem>>, vector<64x1xf32>
    %25 = vector.broadcast %24 : vector<64x1xf32> to vector<64x32xf32>
    %26 = arith.addf %23, %25 : vector<64x32xf32>
    %cst_12 = arith.constant 0.000000e+00 : f32
    %27 = vector.broadcast %cst_12 : f32 to vector<64x32xf32>
    %28 = arith.cmpf oge, %26, %27 : vector<64x32xf32>
    %cst_13 = arith.constant 2.000000e-01 : f32
    %29 = vector.broadcast %cst_13 : f32 to vector<64x32xf32>
    %30 = arith.mulf %29, %26 : vector<64x32xf32>
    %31 = arith.select %28, %26, %30 : vector<64x32xi1>, vector<64x32xf32>
    %c0_14 = arith.constant 0 : index
    %c0_15 = arith.constant 0 : index
    %32 = vector.load %arg4[%c0_14, %c0_15] : memref<64x32xf32, #tpu.memory_space<vmem>>, vector<64x32xf32>
    %33 = arith.mulf %31, %32 : vector<64x32xf32>
    %cst_16 = arith.constant dense<0.000000e+00> : vector<32xf32>
    %34 = vector.multi_reduction <add>, %33, %cst_16 [0] : vector<64x32xf32> to vector<32xf32>
    %35 = vector.shape_cast %34 : vector<32xf32> to vector<1x32xf32>
    %c0_17 = arith.constant 0 : index
    %c0_18 = arith.constant 0 : index
    %36 = vector.load %arg5[%c0_17, %c0_18] : memref<32x2xf32, #tpu.memory_space<vmem>>, vector<32x2xf32>
    %cst_19 = arith.constant dense<0.000000e+00> : vector<1x2xf32>
    %37 = tpu.matmul %35, %36, %cst_19 {dimension_numbers = #tpu.dot_dimension_numbers<[1], [0], [0], [1], [0, 0, 1, 1], [], []>} : vector<1x32xf32>, vector<32x2xf32>, vector<1x2xf32> -> vector<1x2xf32>
    %cst_20 = arith.constant 0.000000e+00 : f32
    %38 = vector.broadcast %cst_20 : f32 to vector<1x2xf32>
    %39 = arith.subf %38, %37 : vector<1x2xf32>
    %40 = math.exp %39 : vector<1x2xf32>
    %cst_21 = arith.constant 1.000000e+00 : f32
    %41 = vector.broadcast %cst_21 : f32 to vector<1x2xf32>
    %42 = arith.addf %41, %40 : vector<1x2xf32>
    %cst_22 = arith.constant 1.000000e+00 : f32
    %43 = vector.broadcast %cst_22 : f32 to vector<1x2xf32>
    %44 = arith.divf %43, %42 : vector<1x2xf32>
    %c0_23 = arith.constant 0 : index
    %c0_24 = arith.constant 0 : index
    %45 = vector.load %arg6[%c0_23, %c0_24] : memref<1x2xf32, #tpu.memory_space<vmem>>, vector<1x2xf32>
    tpu.vector_store %arg6[%c0_23, %c0_24], %44 {strides = array<i32>} : memref<1x2xf32, #tpu.memory_space<vmem>>, vector<1x2xf32>,
    return
  }
}

</mosaic_0001>

<bundles_post_ra>
// kernel: discriminator_forward.4
= control target key start
LH: loop header
LB: loop body
LE: loop exit
PB: predicated region body
PF: predicated region fallthrough
CT: control target
= control target key end

     0   :  { %s555_s9 = smov 0   ;;  %s557_s10 = smov 0   ;;  %s610_s0 = inlined_call_operand.vmem [shape: bf16[48,2048], index: 0, kind: input, shape index: {}]   ;;  %s611_s1 = inlined_call_operand.vmem [shape: bf16[8,48], index: 1, kind: input, shape index: {}]   ;;  %s612_s2 = inlined_call_operand.vmem [shape: bf16[8,2048], index: 2, kind: output, shape index: {}]  }
   0x1   :  { %s559_s11 = smov 0  }
   0x2 LB: > { %s440_s12 = sadd.s32 4294967295, %s537_s11   ;;  %s572_s13 = sadd.s32 1, %s537_s11   ;;  %s537_s11 = sphi %s559_s11, %s615_s11   ;;  %s533_s10 = sphi %s557_s10, %s614_s10   ;;  %s529_s9 = sphi %s555_s9, %s613_s9  }
   0x3   : > { %s16_s14 = ssub.s32 %s537_s11, %s572_s13  ;;  %s19_s15 = sadd.s32 1, %s533_s10 }
   0x4   : > { %p17_p0 = scmp.eq.s32.totalorder %s16_s14, 0  ;;  %p26_p1 = scmp.ne.s32.totalorder %s533_s10, %s529_s9 }
   0x5   : > { %p27_p2 = scmp.eq.s32.totalorder %s537_s11, 0  ;;  %p443_p4 = scmp.ge.s32.totalorder %s537_s11, 4 }
   0x6   : > { %s581_s16 = scalar_select %p17_p0, %s533_s10, %s19_s15  }
   0x7   : > { %p28_p3 = por %p27_p2, %p26_p1  ;;  %102 = sbr.rel (%p443_p4) target bundleno = 22 (0x16), region = 20 }
   0xc   : > { %105 = sbr.rel (!%p28_p3) target bundleno = 22 (0x16), region = 24  ;;  %s107_s17 = sand.u32 (%p28_p3), 1, %s533_s10  }
   0xd   : > { %s467_s18 = sshll.u32 (%p28_p3), %s537_s11, 4  ;;  %s470_s19 = smul.u32 (%p28_p3), 96, %s107_s17 }
   0xe   : > { %s112_s22 = scalar_lea.vmem (%p28_p3), %s610_s0, %s467_s18 }
   0xf   : > { %v125_v0 = vld [vmem:[%s112_s22] sm:$0xff] (%p28_p3)  ;;  %v127_v1 = vld [vmem:[%s112_s22 + $0x8] sm:$0xff] (%p28_p3)  ;;  %s109_s23 = scalar_lea.vmem (%p28_p3), [#allocation2], %s470_s19 }
  0x10   : > { %v129_v2 = vld [vmem:[%s112_s22 + $0x40] sm:$0xff] (%p28_p3)  ;;  %v131_v3 = vld [vmem:[%s112_s22 + $0x48] sm:$0xff] (%p28_p3)  ;;  %126 = vst [vmem:[%s109_s23] sm:$0xff] (%p28_p3), %v125_v0  ;;  %128 = vst [vmem:[%s109_s23 + $0x8] sm:$0xff] (%p28_p3), %v127_v1 }
  0x11   : > { %v133_v4 = vld [vmem:[%s112_s22 + $0x80] sm:$0xff]  ;;  %v135_v5 = vld [vmem:[%s112_s22 + $0x88] sm:$0xff]  ;;  %130 = vst [vmem:[%s109_s23 + $0x10] sm:$0xff] %v129_v2  ;;  %132 = vst [vmem:[%s109_s23 + $0x18] sm:$0xff] %v131_v3 }
  0x12   : > { %134 = vst [vmem:[%s109_s23 + $0x20] sm:$0xff] %v133_v4  ;;  %136 = vst [vmem:[%s109_s23 + $0x28] sm:$0xff] %v135_v5  ;;  %v137_v6 = vld [vmem:[%s112_s22 + $0xc0] sm:$0xff]  ;;  %v139_v7 = vld [vmem:[%s112_s22 + $0xc8] sm:$0xff] }
  0x13   : > { %v141_v8 = vld [vmem:[%s112_s22 + $0x100] sm:$0xff]  ;;  %138 = vst [vmem:[%s109_s23 + $0x30] sm:$0xff] %v137_v6  ;;  %140 = vst [vmem:[%s109_s23 + $0x38] sm:$0xff] %v139_v7  ;;  %v143_v9 = vld [vmem:[%s112_s22 + $0x108] sm:$0xff] }
  0x14   : > { %142 = vst [vmem:[%s109_s23 + $0x40] sm:$0xff] %v141_v8  ;;  %v145_v10 = vld [vmem:[%s112_s22 + $0x140] sm:$0xff]  ;;  %v147_v11 = vld [vmem:[%s112_s22 + $0x148] sm:$0xff]  ;;  %144 = vst [vmem:[%s109_s23 + $0x48] sm:$0xff] %v143_v9 }
  0x15   : > { %146 = vst [vmem:[%s109_s23 + $0x50] sm:$0xff] %v145_v10  ;;  %148 = vst [vmem:[%s109_s23 + $0x58] sm:$0xff] %v147_v11 }
  0x16 PF: > { %p446_p5 = scmp.ge.s32.totalorder %s537_s11, 1  ;;  %p153_p6 = scmp.lt.s32.totalorder %s537_s11, 5 }
  0x18   : > { %p154_p7 = pnand %p446_p5, %p153_p6 }
  0x19   : > { %s160_s24 = sand.u32 (!%p154_p7), 1, %s529_s9   ;;  %s447_s29 = sshll.u32 (!%p154_p7), %s440_s12, 2 }
  0x1a   : > { %157 = sbr.rel (%p154_p7) target bundleno = 246 (0xf6), region = 47  ;;  %p183_p8 = scmp.lt.s32.totalorder (!%p154_p7), %s447_s29, 15 }
  0x1b   : > { %s471_s25 = smul.u32 (!%p154_p7), 96, %s160_s24 }
  0x1d   : > { %s162_s26 = scalar_lea.vmem (!%p154_p7), [#allocation2], %s471_s25 }
  0x1f   : > { %v539_v12 = vmov 0   ;;  %v497_v13 = vld [vmem:[%s162_s26 + $0x44] ss:$16 sps:$4 sm:$0xff]   ;;  %v499_v14 = vld [vmem:[%s162_s26 + $0x4c] ss:$16 sps:$4 sm:$0xff]   ;;  %vm262_vm0 = vcmask 392192  }
  0x20   : > { %298 = vmatprep.mubr.bf16.mxu0 %v539_v12  ;;  %339 = vmatprep.mubr.bf16.mxu1 %v539_v12  ;;  %v501_v15 = vld [vmem:[%s162_s26 + $0x40] ss:$16 sps:$4 sm:$0xff]   ;;  %v502_v16 = vld [vmem:[%s162_s26 + $0x48] ss:$16 sps:$4 sm:$0xff]   ;;  %v503_v17 = vld [vmem:[%s162_s26 + $0x24] ss:$16 sps:$4 sm:$0xff]  }
  0x21   : > { %276 = vmatprep.subr.bf16.mxu0 %v497_v13  ;;  %317 = vmatprep.subr.bf16.mxu1 %v499_v14  ;;  %v505_v18 = vld [vmem:[%s162_s26 + $0x2c] ss:$16 sps:$4 sm:$0xff]   ;;  %v507_v19 = vld [vmem:[%s162_s26 + $0x20] ss:$16 sps:$4 sm:$0xff]   ;;  %v508_v20 = vld [vmem:[%s162_s26 + $0x28] ss:$16 sps:$4 sm:$0xff]  }
  0x22   : > { %277 = vmatpush1.bf16.msra.mxu0 %v501_v15  ;;  %318 = vmatpush1.bf16.msra.mxu1 %v502_v16  ;;  %v509_v21 = vld [vmem:[%s162_s26 + $0x4] ss:$16 sps:$4 sm:$0xff]   ;;  %v511_v22 = vld [vmem:[%s162_s26 + $0xc] ss:$16 sps:$4 sm:$0xff]   ;;  %v513_v23 = vld [vmem:[%s162_s26] ss:$16 sps:$4 sm:$0xff]  }
  0x23   : > { %278 = vmatprep.subr.bf16.mxu0 %v503_v17  ;;  %319 = vmatprep.subr.bf16.mxu1 %v505_v18  ;;  %v514_v24 = vld [vmem:[%s162_s26 + $0x8] ss:$16 sps:$4 sm:$0xff]   ;;  %v189_v25 = vld [vmem:[%s611_s1] sm:$0xf]  ;;  %s617_s29 = smov (!%p183_p8, %s447_s29), 15 }
  0x24   : > { %s448_s30 = sshll.u32 %s617_s29, 2 }
  0x25   : > { %s186_s5 = scalar_lea.vmem %s612_s2, %s448_s30 }
  0x26   : > { %279 = vmatpush1.bf16.msra.mxu0 %v507_v19  ;;  %320 = vmatpush1.bf16.msra.mxu1 %v508_v20 }
  0x27   : > { %280 = vmatprep.subr.bf16.mxu0 %v509_v21  ;;  %321 = vmatprep.subr.bf16.mxu1 %v511_v22 }
  0x2a   : > { %281 = vmatpush1.bf16.msra.mxu0 %v513_v23  ;;  %322 = vmatpush1.bf16.msra.mxu1 %v514_v24 }
  0x2d   : > { %461 = vmatmul.mubr.msk.bf16.vlgmr.msra.gmra.mxu0 %vm262_vm0, %v189_v25  ;;  %462 = vmatmul.mubr.msk.bf16.vlgmr.msra.gmra.mxu1 %vm262_vm0, %v189_v25 }
  0xed   : > { %v300_v26 = vpop.f32.mrf.mxu0  ;;  %v341_v27 = vpop.f32.mrf.mxu1 }
  0xee   : > { %v352_v28 = vmul.f32 0.2, %v300_v26  ;;  %vm348_vm1 = vcmp.ge.f32.partialorder %v300_v26, 0.0  ;;  %v354_v29 = vmul.f32 0.2, %v341_v27  ;;  %vm350_vm2 = vcmp.ge.f32.partialorder %v341_v27, 0.0 }
  0xef   : > { %v302_v30 = vpop.f32.mrf.mxu0  ;;  %v343_v31 = vpop.f32.mrf.mxu1 }
  0xf0   : > { %vm349_vm3 = vcmp.ge.f32.partialorder %v302_v30, 0.0  ;;  %v353_v32 = vmul.f32 0.2, %v302_v30  ;;  %vm351_vm4 = vcmp.ge.f32.partialorder %v343_v31, 0.0  ;;  %v355_v33 = vmul.f32 0.2, %v343_v31 }
  0xf1   : > { %v304_v34 = vpop.f32.mrf.mxu0  ;;  %v345_v35 = vpop.f32.mrf.mxu1  ;;  %v356_v36 = vsel %vm348_vm1, %v300_v26, %v352_v28  ;;  %v358_v38 = vsel %vm350_vm2, %v341_v27, %v354_v29 }
  0xf2   : > { %v357_v37 = vsel %vm349_vm3, %v302_v30, %v353_v32  ;;  %v359_v40 = vsel %vm351_vm4, %v343_v31, %v355_v33 }
  0xf3   : > { %v468_v39 = vpack.c.bf16 %v357_v37, %v356_v36  ;;  %v305_v41 = vpop.f32.mrf.mxu0  ;;  %v346_v42 = vpop.f32.mrf.mxu1  ;;  %v469_v43 = vpack.c.bf16 %v359_v40, %v358_v38 }
  0xf5   : > { %376 = vst [vmem:[%s186_s5] sm:$0xff] %v468_v39  ;;  %377 = vst [vmem:[%s186_s5 + $0x8] sm:$0xff] %v469_v43 }
  0xf6 PF: > { %p9_p9 = scmp.ge.s32.totalorder %s572_s13, 6   ;;  %s613_s9 = smov %s533_s10 }
  0xf7   : > { %s614_s10 = smov %s581_s16  ;;  %s615_s11 = smov %s572_s13 }
  0xf8   :  { %11 = sbr.rel (!%p9_p9) target bundleno = 2 (0x2), region = 86 }

// kernel: discriminator_forward.5
= control target key start
LH: loop header
LB: loop body
LE: loop exit
PB: predicated region body
PF: predicated region fallthrough
CT: control target
= control target key end

     0   :  { %v550_v1 = vmov 0   ;;  %s703_s0 = inlined_call_operand.vmem [shape: bf16[128,512], index: 0, kind: input, shape index: {}]   ;;  %s704_s1 = inlined_call_operand.vmem [shape: bf16[16,128], index: 1, kind: input, shape index: {}]   ;;  %s705_s2 = inlined_call_operand.vmem [shape: f32[16,1], index: 2, kind: input, shape index: {}]   ;;  %s706_s3 = inlined_call_operand.vmem [shape: f32[16,1], index: 3, kind: input, shape index: {}]   ;;  %s707_s4 = inlined_call_operand.vmem [shape: bf16[16,512], index: 4, kind: output, shape index: {}]  }
   0x1   :  { %v497_v0 = vld [vmem:[%s703_s0 + $0xe4] ss:$16 sps:$4 sm:$0xff]   ;;  %250 = vmatprep.mubr.bf16.mxu0 %v550_v1  ;;  %293 = vmatprep.mubr.bf16.mxu1 %v550_v1  ;;  %v499_v2 = vld [vmem:[%s703_s0 + $0xec] ss:$16 sps:$4 sm:$0xff]   ;;  %v501_v3 = vld [vmem:[%s703_s0 + $0xe0] ss:$16 sps:$4 sm:$0xff]  }
   0x2   :  { %496 = vset.pattern.permute.xlu1 %v550_v1  ;;  %495 = vset.pattern.permute.xlu0 %v550_v1  ;;  %v502_v4 = vld [vmem:[%s703_s0 + $0xe8] ss:$16 sps:$4 sm:$0xff]   ;;  %v503_v5 = vld [vmem:[%s703_s0 + $0xc4] ss:$16 sps:$4 sm:$0xff]   ;;  %v505_v6 = vld [vmem:[%s703_s0 + $0xcc] ss:$16 sps:$4 sm:$0xff]  }
   0x3   :  { %218 = vmatprep.subr.bf16.mxu0 %v497_v0  ;;  %261 = vmatprep.subr.bf16.mxu1 %v499_v2  ;;  %v507_v7 = vld [vmem:[%s703_s0 + $0xc0] ss:$16 sps:$4 sm:$0xff]   ;;  %v508_v8 = vld [vmem:[%s703_s0 + $0xc8] ss:$16 sps:$4 sm:$0xff]   ;;  %v509_v9 = vld [vmem:[%s703_s0 + $0xa4] ss:$16 sps:$4 sm:$0xff]  }
   0x4   :  { %219 = vmatpush1.bf16.msra.mxu0 %v501_v3  ;;  %262 = vmatpush1.bf16.msra.mxu1 %v502_v4  ;;  %v511_v10 = vld [vmem:[%s703_s0 + $0xac] ss:$16 sps:$4 sm:$0xff]   ;;  %v513_v11 = vld [vmem:[%s703_s0 + $0xa0] ss:$16 sps:$4 sm:$0xff]   ;;  %v514_v12 = vld [vmem:[%s703_s0 + $0xa8] ss:$16 sps:$4 sm:$0xff]  }
   0x5   :  { %220 = vmatprep.subr.bf16.mxu0 %v503_v5  ;;  %263 = vmatprep.subr.bf16.mxu1 %v505_v6  ;;  %v515_v13 = vld [vmem:[%s703_s0 + $0x84] ss:$16 sps:$4 sm:$0xff]   ;;  %v517_v14 = vld [vmem:[%s703_s0 + $0x8c] ss:$16 sps:$4 sm:$0xff]   ;;  %v519_v15 = vld [vmem:[%s703_s0 + $0x80] ss:$16 sps:$4 sm:$0xff]  }
   0x6   :  { %v520_v16 = vld [vmem:[%s703_s0 + $0x88] ss:$16 sps:$4 sm:$0xff]   ;;  %v521_v17 = vld [vmem:[%s703_s0 + $0x64] ss:$16 sps:$4 sm:$0xff]   ;;  %v523_v18 = vld [vmem:[%s703_s0 + $0x6c] ss:$16 sps:$4 sm:$0xff]  }
   0x7   :  { %v525_v19 = vld [vmem:[%s703_s0 + $0x60] ss:$16 sps:$4 sm:$0xff]   ;;  %v526_v20 = vld [vmem:[%s703_s0 + $0x68] ss:$16 sps:$4 sm:$0xff]   ;;  %v527_v21 = vld [vmem:[%s703_s0 + $0x44] ss:$16 sps:$4 sm:$0xff]  }
   0x8   :  { %221 = vmatpush1.bf16.msra.mxu0 %v507_v7  ;;  %264 = vmatpush1.bf16.msra.mxu1 %v508_v8  ;;  %v529_v22 = vld [vmem:[%s703_s0 + $0x4c] ss:$16 sps:$4 sm:$0xff]   ;;  %v531_v23 = vld [vmem:[%s703_s0 + $0x40] ss:$16 sps:$4 sm:$0xff]   ;;  %v532_v24 = vld [vmem:[%s703_s0 + $0x48] ss:$16 sps:$4 sm:$0xff]  }
   0x9   :  { %222 = vmatprep.subr.bf16.mxu0 %v509_v9  ;;  %265 = vmatprep.subr.bf16.mxu1 %v511_v10  ;;  %v533_v25 = vld [vmem:[%s703_s0 + $0x24] ss:$16 sps:$4 sm:$0xff]   ;;  %v535_v26 = vld [vmem:[%s703_s0 + $0x2c] ss:$16 sps:$4 sm:$0xff]   ;;  %v537_v27 = vld [vmem:[%s703_s0 + $0x20] ss:$16 sps:$4 sm:$0xff]  }
   0xa   :  { %v538_v28 = vld [vmem:[%s703_s0 + $0x28] ss:$16 sps:$4 sm:$0xff]   ;;  %v539_v29 = vld [vmem:[%s703_s0 + $0x4] ss:$16 sps:$4 sm:$0xff]   ;;  %v541_v30 = vld [vmem:[%s703_s0 + $0xc] ss:$16 sps:$4 sm:$0xff]  }
   0xb   :  { %v543_v31 = vld [vmem:[%s703_s0] ss:$16 sps:$4 sm:$0xff]   ;;  %v544_v32 = vld [vmem:[%s703_s0 + $0x8] ss:$16 sps:$4 sm:$0xff]  }
   0xc   :  { %223 = vmatpush1.bf16.msra.mxu0 %v513_v11  ;;  %266 = vmatpush1.bf16.msra.mxu1 %v514_v12  ;;  %v545_v33 = vld [vmem:[%s704_s1] sm:$0xff]   ;;  %v358_v34 = vld [vmem:[%s705_s2 + $0x8] sm:$0xff] }
   0xd   :  { %224 = vmatprep.subr.bf16.mxu0 %v515_v13  ;;  %267 = vmatprep.subr.bf16.mxu1 %v517_v14  ;;  %v377_v35 = vld [vmem:[%s706_s3] sm:$0xff]  ;;  %v378_v13 = vld [vmem:[%s706_s3 + $0x8] sm:$0xff] }
   0xe   :  { %366 = vperm.xlu1 %496, %v358_v34   ;;  %v357_v50 = vld [vmem:[%s705_s2] sm:$0xff] }
  0x10   :  { %225 = vmatpush1.bf16.msra.mxu0 %v519_v15  ;;  %268 = vmatpush1.bf16.msra.mxu1 %v520_v16 }
  0x11   :  { %226 = vmatprep.subr.bf16.mxu0 %v521_v17  ;;  %269 = vmatprep.subr.bf16.mxu1 %v523_v18 }
  0x12   :  { %381 = vperm.xlu1 %496, %v377_v35  }
  0x14   :  { %227 = vmatpush1.bf16.msra.mxu0 %v525_v19  ;;  %270 = vmatpush1.bf16.msra.mxu1 %v526_v20 }
  0x15   :  { %228 = vmatprep.subr.bf16.mxu0 %v527_v21  ;;  %271 = vmatprep.subr.bf16.mxu1 %v529_v22 }
  0x18   :  { %229 = vmatpush1.bf16.msra.mxu0 %v531_v23  ;;  %272 = vmatpush1.bf16.msra.mxu1 %v532_v24 }
  0x19   :  { %230 = vmatprep.subr.bf16.mxu0 %v533_v25  ;;  %273 = vmatprep.subr.bf16.mxu1 %v535_v26 }
  0x1c   :  { %231 = vmatpush1.bf16.msra.mxu0 %v537_v27  ;;  %274 = vmatpush1.bf16.msra.mxu1 %v538_v28 }
  0x1d   :  { %232 = vmatprep.subr.bf16.mxu0 %v539_v29  ;;  %275 = vmatprep.subr.bf16.mxu1 %v541_v30 }
  0x20   :  { %233 = vmatpush1.bf16.msra.mxu0 %v543_v31  ;;  %276 = vmatpush1.bf16.msra.mxu1 %v544_v32 }
  0x23   :  { %251 = vmatmul.mubr.bf16.vlgmr.msra.gmra.mxu0 %v545_v33  ;;  %294 = vmatmul.mubr.bf16.vlgmr.msra.gmra.mxu1 %v545_v33 }
  0x89   :  { %v367_v14 = vpop.permute.xlu1 %366 }
  0x8d   :  { %v382_v15 = vpop.permute.xlu1 %381 }
  0xe3   :  { %v252_v36 = vpop.f32.mrf.mxu0  ;;  %v295_v37 = vpop.f32.mrf.mxu1 }
  0xe5   :  { %v254_v38 = vpop.f32.mrf.mxu0  ;;  %v297_v39 = vpop.f32.mrf.mxu1 }
  0xe6   :  { %v304_v40 = vadd.f32 %v254_v38, %v252_v36 }
  0xe7   :  { %v256_v41 = vpop.f32.mrf.mxu0  ;;  %v299_v43 = vpop.f32.mrf.mxu1 }
  0xe8   :  { %v305_v42 = vadd.f32 %v304_v40, %v295_v37 }
  0xe9   :  { %v258_v44 = vpop.f32.mrf.mxu0  ;;  %v301_v48 = vpop.f32.mrf.mxu1 }
  0xea   :  { %v309_v45 = vadd.f32 %v258_v44, %v256_v41  ;;  %v306_v46 = vadd.f32 %v305_v42, %v297_v39 }
  0xec   :  { %v310_v47 = vadd.f32 %v309_v45, %v299_v43  ;;  %307 = vadd.xlane.f32.xlu0 %v306_v46 }
  0xee   :  { %v311_v49 = vadd.f32 %v310_v47, %v301_v48 }
  0xf0   :  { %312 = vadd.xlane.f32.xlu0 %v311_v49 }
 0x106   :  { %361 = vperm.xlu0 %495, %v357_v50  }
 0x175   :  { %v308_v51 = vpop.xlane.xlu0 %307 }
 0x176   :  { %v315_v52 = vmul.f32 0.001953125, %v308_v51 }
 0x178   :  { %v317_v53 = vsub.f32 %v252_v36, %v315_v52  ;;  %v318_v54 = vsub.f32 %v254_v38, %v315_v52  ;;  %v319_v55 = vsub.f32 %v295_v37, %v315_v52  ;;  %v320_v57 = vsub.f32 %v297_v39, %v315_v52 }
 0x179   :  { %v313_v56 = vpop.xlane.xlu0 %312 }
 0x17a   :  { %v316_v58 = vmul.f32 0.001953125, %v313_v56  ;;  %v325_v59 = vmul.f32 %v317_v53, %v317_v53  ;;  %v326_v60 = vmul.f32 %v318_v54, %v318_v54  ;;  %v327_v61 = vmul.f32 %v319_v55, %v319_v55 }
 0x17b   :  { %v328_v2 = vmul.f32 %v320_v57, %v320_v57 }
 0x17c   :  { %v321_v62 = vsub.f32 %v256_v41, %v316_v58  ;;  %v322_v63 = vsub.f32 %v258_v44, %v316_v58  ;;  %v333_v0 = vadd.f32 %v326_v60, %v325_v59  ;;  %v323_v1 = vsub.f32 %v299_v43, %v316_v58 }
 0x17d   :  { %v324_v4 = vsub.f32 %v301_v48, %v316_v58 }
 0x17e   :  { %v334_v3 = vadd.f32 %v333_v0, %v327_v61  ;;  %v329_v5 = vmul.f32 %v321_v62, %v321_v62  ;;  %v330_v6 = vmul.f32 %v322_v63, %v322_v63  ;;  %v331_v8 = vmul.f32 %v323_v1, %v323_v1 }
 0x17f   :  { %v332_v10 = vmul.f32 %v324_v4, %v324_v4 }
 0x180   :  { %v335_v7 = vadd.f32 %v334_v3, %v328_v2  ;;  %v338_v9 = vadd.f32 %v330_v6, %v329_v5 }
 0x181   :  { %v362_v23 = vpop.permute.xlu0 %361 }
 0x182   :  { %336 = vadd.xlane.f32.xlu1 %v335_v7  ;;  %v339_v11 = vadd.f32 %v338_v9, %v331_v8 }
 0x184   :  { %v340_v12 = vadd.f32 %v339_v11, %v332_v10 }
 0x186   :  { %341 = vadd.xlane.f32.xlu1 %v340_v12 }
 0x197   :  { %386 = vperm.xlu1 %496, %v378_v13  }
 0x20b   :  { %v337_v16 = vpop.xlane.xlu1 %336 }
 0x20c   :  { %v343_v17 = vmul.f32 0.001953125, %v337_v16 }
 0x20e   :  { %v345_v18 = vadd.f32 1e-05, %v343_v17 }
 0x20f   :  { %v342_v19 = vpop.xlane.xlu1 %341 }
 0x210   :  { %546 = vrsqrt.f32 %v345_v18  ;;  %v344_v20 = vmul.f32 0.001953125, %v342_v19 }
 0x212   :  { %v346_v21 = vadd.f32 1e-05, %v344_v20 }
 0x213   :  { %v387_v45 = vpop.permute.xlu1 %386 }
 0x214   :  { %548 = vrsqrt.f32 %v346_v21 }
 0x21d   :  { %v547_v22 = vpop.eup %546 }
 0x21e   :  { %v349_v24 = vmul.f32 %v547_v22, %v317_v53  ;;  %v350_v25 = vmul.f32 %v547_v22, %v318_v54  ;;  %v351_v26 = vmul.f32 %v547_v22, %v319_v55  ;;  %v352_v27 = vmul.f32 %v547_v22, %v320_v57 }
 0x220   :  { %v369_v28 = vmul.f32 %v362_v23, %v349_v24  ;;  %v370_v29 = vmul.f32 %v362_v23, %v350_v25  ;;  %v371_v30 = vmul.f32 %v362_v23, %v351_v26  ;;  %v372_v31 = vmul.f32 %v362_v23, %v352_v27 }
 0x221   :  { %v549_v32 = vpop.eup %548 }
 0x222   :  { %v353_v33 = vmul.f32 %v549_v32, %v321_v62  ;;  %v354_v34 = vmul.f32 %v549_v32, %v322_v63  ;;  %v355_v35 = vmul.f32 %v549_v32, %v323_v1  ;;  %v356_v36 = vmul.f32 %v549_v32, %v324_v4 }
 0x223   :  { %v389_v37 = vadd.f32 %v382_v15, %v369_v28  ;;  %v390_v38 = vadd.f32 %v382_v15, %v370_v29  ;;  %v391_v39 = vadd.f32 %v382_v15, %v371_v30  ;;  %v392_v40 = vadd.f32 %v382_v15, %v372_v31 }
 0x224   :  { %v373_v41 = vmul.f32 %v367_v14, %v353_v33  ;;  %v374_v42 = vmul.f32 %v367_v14, %v354_v34  ;;  %v375_v43 = vmul.f32 %v367_v14, %v355_v35  ;;  %v376_v44 = vmul.f32 %v367_v14, %v356_v36 }
 0x225   :  { %vm397_vm0 = vcmp.ge.f32.partialorder %v389_v37, 0.0  ;;  %vm398_vm1 = vcmp.ge.f32.partialorder %v390_v38, 0.0  ;;  %vm399_vm2 = vcmp.ge.f32.partialorder %v391_v39, 0.0  ;;  %vm400_vm3 = vcmp.ge.f32.partialorder %v392_v40, 0.0 }
 0x226   :  { %v393_v46 = vadd.f32 %v387_v45, %v373_v41  ;;  %v394_v47 = vadd.f32 %v387_v45, %v374_v42  ;;  %v395_v48 = vadd.f32 %v387_v45, %v375_v43  ;;  %v396_v49 = vadd.f32 %v387_v45, %v376_v44 }
 0x227   :  { %v405_v50 = vmul.f32 0.2, %v389_v37  ;;  %v406_v51 = vmul.f32 0.2, %v390_v38  ;;  %v407_v52 = vmul.f32 0.2, %v391_v39 }
 0x228   :  { %vm401_vm4 = vcmp.ge.f32.partialorder %v393_v46, 0.0  ;;  %vm402_vm5 = vcmp.ge.f32.partialorder %v394_v47, 0.0  ;;  %vm403_vm6 = vcmp.ge.f32.partialorder %v395_v48, 0.0  ;;  %vm404_vm7 = vcmp.ge.f32.partialorder %v396_v49, 0.0 }
 0x229   :  { %v409_v53 = vmul.f32 0.2, %v393_v46  ;;  %v410_v54 = vmul.f32 0.2, %v394_v47  ;;  %v411_v55 = vmul.f32 0.2, %v395_v48  ;;  %v413_v56 = vsel %vm397_vm0, %v389_v37, %v405_v50 }
 0x22a   :  { %v412_v57 = vmul.f32 0.2, %v396_v49  ;;  %v408_v58 = vmul.f32 0.2, %v392_v40  ;;  %v414_v59 = vsel %vm398_vm1, %v390_v38, %v406_v51  ;;  %v415_v60 = vsel %vm399_vm2, %v391_v39, %v407_v52 }
 0x22b   :  { %v417_v61 = vsel %vm401_vm4, %v393_v46, %v409_v53  ;;  %v418_v62 = vsel %vm402_vm5, %v394_v47, %v410_v54  ;;  %v419_v63 = vsel %vm403_vm6, %v395_v48, %v411_v55  ;;  %v490_v0 = vpack.c.bf16 %v414_v59, %v413_v56 }
 0x22c   :  { %v420_v1 = vsel %vm404_vm7, %v396_v49, %v412_v57  ;;  %v492_v2 = vpack.c.bf16 %v418_v62, %v417_v61  ;;  %v416_v3 = vsel %vm400_vm3, %v392_v40, %v408_v58 }
 0x22d   :  { %v493_v4 = vpack.c.bf16 %v420_v1, %v419_v63  ;;  %v491_v5 = vpack.c.bf16 %v416_v3, %v415_v60  ;;  %445 = vst [vmem:[%s707_s4] sm:$0xff] %v490_v0 }
 0x22e   :  { %447 = vst [vmem:[%s707_s4 + $0x10] sm:$0xff] %v492_v2 }
 0x22f   :  { %448 = vst [vmem:[%s707_s4 + $0x18] sm:$0xff] %v493_v4  ;;  %446 = vst [vmem:[%s707_s4 + $0x8] sm:$0xff] %v491_v5 }

// kernel: discriminator_forward.6
= control target key start
LH: loop header
LB: loop body
LE: loop exit
PB: predicated region body
PF: predicated region fallthrough
CT: control target
= control target key end

     0   :  { %v472_v20 = vmov 0   ;;  %s588_s0 = inlined_call_operand.vmem [shape: bf16[256,128], index: 0, kind: input, shape index: {}]   ;;  %s589_s1 = inlined_call_operand.vmem [shape: bf16[32,256], index: 1, kind: input, shape index: {}]   ;;  %s590_s2 = inlined_call_operand.vmem [shape: f32[32,1], index: 2, kind: input, shape index: {}]   ;;  %s591_s3 = inlined_call_operand.vmem [shape: f32[32,1], index: 3, kind: input, shape index: {}]   ;;  %s592_s4 = inlined_call_operand.vmem [shape: bf16[32,128], index: 4, kind: output, shape index: {}]  }
   0x1   :  { %v442_v0 = vld [vmem:[%s588_s0 + $0x78] sm:$0xff]   ;;  %v444_v2 = vld [vmem:[%s588_s0 + $0x70] sm:$0xff]   ;;  %v446_v4 = vld [vmem:[%s588_s0 + $0x68] sm:$0xff]   ;;  %441 = vset.pattern.permute.xlu1 %v472_v20  ;;  %440 = vset.pattern.permute.xlu0 %v472_v20 }
   0x2   :  { %v443_v1 = vld [vmem:[%s588_s0 + $0x38] sm:$0xff]   ;;  %395 = vmatprep.subr.bf16.mxu0 %v442_v0  ;;  %423 = vmatprep.subr.bf16.mxu1 %v442_v0  ;;  %v445_v3 = vld [vmem:[%s588_s0 + $0x30] sm:$0xff]   ;;  %v447_v5 = vld [vmem:[%s588_s0 + $0x28] sm:$0xff]  }
   0x3   :  { %396 = vmatpush3.bf16.msra.mxu0 %v443_v1  ;;  %431 = vmatpush3.bf16.msra.mxu1 %v443_v1  ;;  %v448_v6 = vld [vmem:[%s588_s0 + $0x60] sm:$0xff]   ;;  %v450_v8 = vld [vmem:[%s588_s0 + $0x58] sm:$0xff]   ;;  %v452_v10 = vld [vmem:[%s588_s0 + $0x50] sm:$0xff]  }
   0x4   :  { %397 = vmatprep.subr.bf16.mxu0 %v444_v2  ;;  %424 = vmatprep.subr.bf16.mxu1 %v444_v2  ;;  %v449_v7 = vld [vmem:[%s588_s0 + $0x20] sm:$0xff]   ;;  %v451_v9 = vld [vmem:[%s588_s0 + $0x18] sm:$0xff]   ;;  %v453_v13 = vld [vmem:[%s588_s0 + $0x10] sm:$0xff]  }
   0x5   :  { %v460_v11 = vld [vmem:[%s589_s1 + $0x4] ss:$8 sps:$4 sm:$0xff]   ;;  %v463_v12 = vld [vmem:[%s589_s1 + $0x14] ss:$8 sps:$4 sm:$0xff]   ;;  %v458_v18 = vld [vmem:[%s589_s1] ss:$8 sps:$4 sm:$0xff]  }
   0x6   :  { %v454_v14 = vld [vmem:[%s588_s0 + $0x48] sm:$0xff]   ;;  %202 = vmatprep.mubr.bf16.mxu0 %v460_v11  ;;  %210 = vmatprep.mubr.bf16.mxu1 %v463_v12  ;;  %v456_v16 = vld [vmem:[%s588_s0 + $0x40] sm:$0xff]   ;;  %v461_v19 = vld [vmem:[%s589_s1 + $0x10] ss:$8 sps:$4 sm:$0xff]  }
   0x7   :  { %398 = vmatpush3.bf16.msra.mxu0 %v445_v3  ;;  %432 = vmatpush3.bf16.msra.mxu1 %v445_v3  ;;  %v455_v15 = vld [vmem:[%s588_s0 + $0x8] sm:$0xff]   ;;  %v457_v17 = vld [vmem:[%s588_s0] sm:$0xff]   ;;  %v266_v34 = vld [vmem:[%s590_s2 + $0x10] sm:$0xff] }
   0x8   :  { %399 = vmatprep.subr.bf16.mxu0 %v446_v4  ;;  %425 = vmatprep.subr.bf16.mxu1 %v446_v4  ;;  %v265_v33 = vld [vmem:[%s590_s2 + $0x8] sm:$0xff]  ;;  %v267_v35 = vld [vmem:[%s590_s2 + $0x18] sm:$0xff]  ;;  %v292_v36 = vld [vmem:[%s591_s3] sm:$0xff] }
   0x9   :  { %v293_v37 = vld [vmem:[%s591_s3 + $0x8] sm:$0xff]  ;;  %v294_v38 = vld [vmem:[%s591_s3 + $0x10] sm:$0xff]  ;;  %v295_v55 = vld [vmem:[%s591_s3 + $0x18] sm:$0xff] }
   0xa   :  { %v264_v56 = vld [vmem:[%s590_s2] sm:$0xff] }
   0xb   :  { %400 = vmatpush3.bf16.msra.mxu0 %v447_v5  ;;  %433 = vmatpush3.bf16.msra.mxu1 %v447_v5 }
   0xc   :  { %401 = vmatprep.subr.bf16.mxu0 %v448_v6  ;;  %426 = vmatprep.subr.bf16.mxu1 %v448_v6 }
   0xf   :  { %402 = vmatpush3.bf16.msra.mxu0 %v449_v7  ;;  %434 = vmatpush3.bf16.msra.mxu1 %v449_v7 }
  0x10   :  { %403 = vmatprep.subr.bf16.mxu0 %v450_v8  ;;  %427 = vmatprep.subr.bf16.mxu1 %v450_v8 }
  0x13   :  { %404 = vmatpush3.bf16.msra.mxu0 %v451_v9  ;;  %435 = vmatpush3.bf16.msra.mxu1 %v451_v9 }
  0x14   :  { %405 = vmatprep.subr.bf16.mxu0 %v452_v10  ;;  %428 = vmatprep.subr.bf16.mxu1 %v452_v10 }
  0x17   :  { %406 = vmatpush3.bf16.msra.mxu0 %v453_v13  ;;  %436 = vmatpush3.bf16.msra.mxu1 %v453_v13 }
  0x18   :  { %407 = vmatprep.subr.bf16.mxu0 %v454_v14  ;;  %429 = vmatprep.subr.bf16.mxu1 %v454_v14 }
  0x1b   :  { %408 = vmatpush3.bf16.msra.mxu0 %v455_v15  ;;  %437 = vmatpush3.bf16.msra.mxu1 %v455_v15 }
  0x1c   :  { %409 = vmatprep.subr.bf16.mxu0 %v456_v16  ;;  %430 = vmatprep.subr.bf16.mxu1 %v456_v16 }
  0x1f   :  { %410 = vmatpush3.bf16.msra.mxu0 %v457_v17  ;;  %438 = vmatpush3.bf16.msra.mxu1 %v457_v17 }
  0x22   :  { %203 = vmatmul.mubr.bf16.vlgmr.msra.gmra.mxu0 %v458_v18  ;;  %211 = vmatmul.mubr.bf16.vlgmr.msra.gmra.mxu1 %v461_v19 }
  0xe2   :  { %v411_v21 = vpop.f32.mrf.mxu0  ;;  %v417_v22 = vpop.f32.mrf.mxu1 }
  0xe4   :  { %v412_v23 = vpop.f32.mrf.mxu0  ;;  %v418_v24 = vpop.f32.mrf.mxu1 }
  0xe5   :  { %v413_v25 = vadd.f32 %v412_v23, %v411_v21  ;;  %v419_v26 = vadd.f32 %v418_v24, %v417_v22 }
  0xe6   :  { %v414_v27 = vpop.f32.mrf.mxu0  ;;  %v420_v28 = vpop.f32.mrf.mxu1 }
  0xe7   :  { %223 = vadd.xlane.f32.xlu1 %v419_v26  ;;  %219 = vadd.xlane.f32.xlu0 %v413_v25 }
  0xe8   :  { %v415_v29 = vpop.f32.mrf.mxu0  ;;  %v421_v30 = vpop.f32.mrf.mxu1 }
  0xe9   :  { %v416_v31 = vadd.f32 %v415_v29, %v414_v27  ;;  %v422_v32 = vadd.f32 %v421_v30, %v420_v28 }
  0xeb   :  { %225 = vadd.xlane.f32.xlu1 %v422_v32  ;;  %221 = vadd.xlane.f32.xlu0 %v416_v31 }
  0xfc   :  { %275 = vperm.xlu1 %441, %v265_v33  }
 0x100   :  { %280 = vperm.xlu1 %441, %v266_v34  }
 0x104   :  { %285 = vperm.xlu1 %441, %v267_v35  }
 0x108   :  { %298 = vperm.xlu1 %441, %v292_v36  }
 0x10c   :  { %303 = vperm.xlu1 %441, %v293_v37  }
 0x110   :  { %308 = vperm.xlu1 %441, %v294_v38  }
 0x170   :  { %v224_v39 = vpop.xlane.xlu1 %223  ;;  %v220_v40 = vpop.xlane.xlu0 %219 }
 0x171   :  { %v230_v41 = vmul.f32 0.0078125, %v224_v39  ;;  %v228_v42 = vmul.f32 0.0078125, %v220_v40 }
 0x173   :  { %v232_v43 = vsub.f32 %v413_v25, %v228_v42  ;;  %v234_v46 = vsub.f32 %v419_v26, %v230_v41 }
 0x174   :  { %v226_v44 = vpop.xlane.xlu1 %225  ;;  %v222_v45 = vpop.xlane.xlu0 %221 }
 0x175   :  { %v231_v47 = vmul.f32 0.0078125, %v226_v44  ;;  %v229_v48 = vmul.f32 0.0078125, %v222_v45  ;;  %v236_v49 = vmul.f32 %v232_v43, %v232_v43  ;;  %v238_v52 = vmul.f32 %v234_v46, %v234_v46 }
 0x177   :  { %v233_v50 = vsub.f32 %v416_v31, %v229_v48  ;;  %240 = vadd.xlane.f32.xlu0 %v236_v49  ;;  %v235_v51 = vsub.f32 %v422_v32, %v231_v47 }
 0x178   :  { %v276_v57 = vpop.permute.xlu1 %275 }
 0x179   :  { %v237_v53 = vmul.f32 %v233_v50, %v233_v50  ;;  %v239_v54 = vmul.f32 %v235_v51, %v235_v51 }
 0x17b   :  { %244 = vadd.xlane.f32.xlu0 %v238_v52  ;;  %242 = vadd.xlane.f32.xlu1 %v237_v53 }
 0x17c   :  { %v281_v58 = vpop.permute.xlu1 %280 }
 0x17f   :  { %246 = vadd.xlane.f32.xlu1 %v239_v54 }
 0x180   :  { %v286_v59 = vpop.permute.xlu1 %285 }
 0x184   :  { %v299_v60 = vpop.permute.xlu1 %298 }
 0x188   :  { %v304_v61 = vpop.permute.xlu1 %303 }
 0x18c   :  { %v309_v62 = vpop.permute.xlu1 %308 }
 0x190   :  { %313 = vperm.xlu1 %441, %v295_v55  }
 0x191   :  { %270 = vperm.xlu0 %440, %v264_v56  }
 0x200   :  { %v241_v63 = vpop.xlane.xlu0 %240 }
 0x201   :  { %v248_v0 = vmul.f32 0.0078125, %v241_v63 }
 0x203   :  { %v252_v1 = vadd.f32 1e-05, %v248_v0 }
 0x204   :  { %v243_v2 = vpop.xlane.xlu1 %242  ;;  %v245_v3 = vpop.xlane.xlu0 %244 }
 0x205   :  { %464 = vrsqrt.f32 %v252_v1  ;;  %v249_v4 = vmul.f32 0.0078125, %v243_v2  ;;  %v250_v5 = vmul.f32 0.0078125, %v245_v3 }
 0x207   :  { %v253_v6 = vadd.f32 1e-05, %v249_v4  ;;  %v254_v7 = vadd.f32 1e-05, %v250_v5 }
 0x208   :  { %v247_v8 = vpop.xlane.xlu1 %246 }
 0x209   :  { %466 = vrsqrt.f32 %v253_v6  ;;  %v251_v9 = vmul.f32 0.0078125, %v247_v8 }
 0x20a   :  { %468 = vrsqrt.f32 %v254_v7 }
 0x20b   :  { %v255_v10 = vadd.f32 1e-05, %v251_v9 }
 0x20c   :  { %v271_v12 = vpop.permute.xlu0 %270  ;;  %v314_v29 = vpop.permute.xlu1 %313 }
 0x20d   :  { %470 = vrsqrt.f32 %v255_v10 }
 0x212   :  { %v465_v11 = vpop.eup %464 }
 0x213   :  { %v260_v13 = vmul.f32 %v465_v11, %v232_v43 }
 0x215   :  { %v288_v14 = vmul.f32 %v271_v12, %v260_v13 }
 0x216   :  { %v467_v15 = vpop.eup %466 }
 0x217   :  { %v469_v16 = vpop.eup %468  ;;  %v261_v17 = vmul.f32 %v467_v15, %v233_v50  ;;  %v316_v18 = vadd.f32 %v299_v60, %v288_v14 }
 0x218   :  { %v262_v19 = vmul.f32 %v469_v16, %v234_v46 }
 0x219   :  { %v289_v20 = vmul.f32 %v276_v57, %v261_v17  ;;  %v324_v25 = vmul.f32 0.2, %v316_v18  ;;  %vm320_vm0 = vcmp.ge.f32.partialorder %v316_v18, 0.0 }
 0x21a   :  { %v471_v21 = vpop.eup %470  ;;  %v290_v22 = vmul.f32 %v281_v58, %v262_v19 }
 0x21b   :  { %v263_v23 = vmul.f32 %v471_v21, %v235_v51  ;;  %v317_v24 = vadd.f32 %v304_v61, %v289_v20  ;;  %v328_v33 = vsel %vm320_vm0, %v316_v18, %v324_v25 }
 0x21c   :  { %v318_v26 = vadd.f32 %v309_v62, %v290_v22 }
 0x21d   :  { %v291_v27 = vmul.f32 %v286_v59, %v263_v23  ;;  %vm321_vm1 = vcmp.ge.f32.partialorder %v317_v24, 0.0  ;;  %v325_v28 = vmul.f32 0.2, %v317_v24 }
 0x21e   :  { %v326_v31 = vmul.f32 0.2, %v318_v26  ;;  %vm322_vm2 = vcmp.ge.f32.partialorder %v318_v26, 0.0 }
 0x21f   :  { %v319_v30 = vadd.f32 %v314_v29, %v291_v27  ;;  %v329_v32 = vsel %vm321_vm1, %v317_v24, %v325_v28 }
 0x220   :  { %v387_v34 = vpack.c.bf16 %v329_v32, %v328_v33  ;;  %v330_v36 = vsel %vm322_vm2, %v318_v26, %v326_v31 }
 0x221   :  { %vm323_vm3 = vcmp.ge.f32.partialorder %v319_v30, 0.0  ;;  %v327_v35 = vmul.f32 0.2, %v319_v30 }
 0x222   :  { %388 = vst [vmem:[%s592_s4] sm:$0xff] %v387_v34  }
 0x223   :  { %v331_v37 = vsel %vm323_vm3, %v319_v30, %v327_v35 }
 0x224   :  { %v392_v38 = vpack.c.bf16 %v331_v37, %v330_v36 }
 0x226   :  { %394 = vst [vmem:[%s592_s4 + $0x8] sm:$0xff] %v392_v38  }

// kernel: discriminator_forward.7
= control target key start
LH: loop header
LB: loop body
LE: loop exit
PB: predicated region body
PF: predicated region fallthrough
CT: control target
= control target key end

     0   :  { %s1536_s0 = inlined_call_operand.vmem [shape: bf16[512,32], index: 0, kind: input, shape index: {}]   ;;  %s1537_s1 = inlined_call_operand.vmem [shape: bf16[64,512], index: 1, kind: input, shape index: {}]   ;;  %s1538_s2 = inlined_call_operand.vmem [shape: f32[64,1], index: 2, kind: input, shape index: {}]   ;;  %s1539_s3 = inlined_call_operand.vmem [shape: f32[64,1], index: 3, kind: input, shape index: {}]   ;;  %s1540_s4 = inlined_call_operand.vmem [shape: f32[64,32], index: 4, kind: input, shape index: {}]   ;;  %s1541_s5 = inlined_call_operand.vmem [shape: f32[32,2], index: 5, kind: input, shape index: {}]   ;;  %s1542_s6 = inlined_call_operand.hbm [shape: f32[1,2], index: 6, kind: output, shape index: {}]  }
   0x1   :  { %v1036_v0 = vld [vmem:[%s1536_s0 + $0x78] sm:$0xff]   ;;  %v1040_v4 = vld [vmem:[%s1536_s0 + $0x70] sm:$0xff]   ;;  %v1044_v8 = vld [vmem:[%s1536_s0 + $0x68] sm:$0xff]  }
   0x2   :  { %v1037_v1 = vld [vmem:[%s1536_s0 + $0xf8] sm:$0xff]   ;;  %934 = vmatprep.subr.bf16.mxu0 %v1036_v0  ;;  %v1041_v5 = vld [vmem:[%s1536_s0 + $0xf0] sm:$0xff]   ;;  %v1045_v9 = vld [vmem:[%s1536_s0 + $0xe8] sm:$0xff]  }
   0x3   :  { %v1038_v2 = vld [vmem:[%s1536_s0 + $0x38] sm:$0xff]   ;;  %974 = vmatprep.subr.bf16.mxu1 %v1037_v1  ;;  %v1042_v6 = vld [vmem:[%s1536_s0 + $0x30] sm:$0xff]   ;;  %v1046_v10 = vld [vmem:[%s1536_s0 + $0x28] sm:$0xff]  }
   0x4   :  { %v1039_v3 = vld [vmem:[%s1536_s0 + $0xb8] sm:$0xff]   ;;  %935 = vmatpush3.bf16.msra.mxu0 %v1038_v2  ;;  %v1043_v7 = vld [vmem:[%s1536_s0 + $0xb0] sm:$0xff]   ;;  %v1047_v11 = vld [vmem:[%s1536_s0 + $0xa8] sm:$0xff]  }
   0x5   :  { %975 = vmatpush3.bf16.msra.mxu1 %v1039_v3  ;;  %936 = vmatprep.subr.bf16.mxu0 %v1040_v4  ;;  %v1048_v12 = vld [vmem:[%s1536_s0 + $0x60] sm:$0xff]   ;;  %v1052_v16 = vld [vmem:[%s1536_s0 + $0x58] sm:$0xff]   ;;  %v1056_v20 = vld [vmem:[%s1536_s0 + $0x50] sm:$0xff]  }
   0x6   :  { %976 = vmatprep.subr.bf16.mxu1 %v1041_v5  ;;  %v1049_v13 = vld [vmem:[%s1536_s0 + $0xe0] sm:$0xff]   ;;  %v1053_v17 = vld [vmem:[%s1536_s0 + $0xd8] sm:$0xff]   ;;  %v1057_v21 = vld [vmem:[%s1536_s0 + $0xd0] sm:$0xff]  }
   0x7   :  { %v1050_v14 = vld [vmem:[%s1536_s0 + $0x20] sm:$0xff]   ;;  %v1054_v18 = vld [vmem:[%s1536_s0 + $0x18] sm:$0xff]   ;;  %v1058_v22 = vld [vmem:[%s1536_s0 + $0x10] sm:$0xff]  }
   0x8   :  { %937 = vmatpush3.bf16.msra.mxu0 %v1042_v6  ;;  %v1051_v15 = vld [vmem:[%s1536_s0 + $0xa0] sm:$0xff]   ;;  %v1055_v19 = vld [vmem:[%s1536_s0 + $0x98] sm:$0xff]   ;;  %v1059_v23 = vld [vmem:[%s1536_s0 + $0x90] sm:$0xff]  }
   0x9   :  { %977 = vmatpush3.bf16.msra.mxu1 %v1043_v7  ;;  %938 = vmatprep.subr.bf16.mxu0 %v1044_v8  ;;  %v1060_v24 = vld [vmem:[%s1536_s0 + $0x48] sm:$0xff]   ;;  %v1064_v28 = vld [vmem:[%s1536_s0 + $0x40] sm:$0xff]  }
   0xa   :  { %978 = vmatprep.subr.bf16.mxu1 %v1045_v9  ;;  %v1061_v25 = vld [vmem:[%s1536_s0 + $0xc8] sm:$0xff]   ;;  %v1065_v29 = vld [vmem:[%s1536_s0 + $0xc0] sm:$0xff]  }
   0xb   :  { %v1062_v26 = vld [vmem:[%s1536_s0 + $0x8] sm:$0xff]   ;;  %v1066_v30 = vld [vmem:[%s1536_s0] sm:$0xff]  }
   0xc   :  { %939 = vmatpush3.bf16.msra.mxu0 %v1046_v10  ;;  %v1063_v27 = vld [vmem:[%s1536_s0 + $0x88] sm:$0xff]   ;;  %v1067_v31 = vld [vmem:[%s1536_s0 + $0x80] sm:$0xff]  }
   0xd   :  { %979 = vmatpush3.bf16.msra.mxu1 %v1047_v11  ;;  %940 = vmatprep.subr.bf16.mxu0 %v1048_v12  ;;  %v1068_v32 = vld [vmem:[%s1537_s1] ss:$16 sps:$4 sm:$0xff]   ;;  %v1070_v33 = vld [vmem:[%s1537_s1 + $0x4] ss:$16 sps:$4 sm:$0xff]   ;;  %v1071_v34 = vld [vmem:[%s1537_s1 + $0x8] ss:$16 sps:$4 sm:$0xff]  }
   0xe   :  { %980 = vmatprep.subr.bf16.mxu1 %v1049_v13  ;;  %v1073_v35 = vld [vmem:[%s1537_s1 + $0xc] ss:$16 sps:$4 sm:$0xff]   ;;  %409 = vmatprep.mubr.bf16.mxu0 %v1070_v33  ;;  %v1074_v36 = vld [vmem:[%s1537_s1 + $0x24] ss:$16 sps:$4 sm:$0xff]   ;;  %v1078_v38 = vld [vmem:[%s1537_s1 + $0x20] ss:$16 sps:$4 sm:$0xff]  }
   0xf   :  { %474 = vmatprep.mubr.bf16.mxu1 %v1073_v35  ;;  %v1076_v37 = vld [vmem:[%s1537_s1 + $0x2c] ss:$16 sps:$4 sm:$0xff]   ;;  %v1079_v39 = vld [vmem:[%s1537_s1 + $0x28] ss:$16 sps:$4 sm:$0xff]   ;;  %v1080_v40 = vld [vmem:[%s1537_s1 + $0x44] ss:$16 sps:$4 sm:$0xff]  }
  0x10   :  { %941 = vmatpush3.bf16.msra.mxu0 %v1050_v14  ;;  %v1082_v41 = vld [vmem:[%s1537_s1 + $0x4c] ss:$16 sps:$4 sm:$0xff]  }
  0x11   :  { %981 = vmatpush3.bf16.msra.mxu1 %v1051_v15  ;;  %942 = vmatprep.subr.bf16.mxu0 %v1052_v16 }
  0x12   :  { %982 = vmatprep.subr.bf16.mxu1 %v1053_v17 }
  0x14   :  { %943 = vmatpush3.bf16.msra.mxu0 %v1054_v18 }
  0x15   :  { %983 = vmatpush3.bf16.msra.mxu1 %v1055_v19  ;;  %944 = vmatprep.subr.bf16.mxu0 %v1056_v20 }
  0x16   :  { %984 = vmatprep.subr.bf16.mxu1 %v1057_v21 }
  0x18   :  { %945 = vmatpush3.bf16.msra.mxu0 %v1058_v22 }
  0x19   :  { %985 = vmatpush3.bf16.msra.mxu1 %v1059_v23  ;;  %946 = vmatprep.subr.bf16.mxu0 %v1060_v24 }
  0x1a   :  { %986 = vmatprep.subr.bf16.mxu1 %v1061_v25 }
  0x1c   :  { %947 = vmatpush3.bf16.msra.mxu0 %v1062_v26 }
  0x1d   :  { %987 = vmatpush3.bf16.msra.mxu1 %v1063_v27  ;;  %948 = vmatprep.subr.bf16.mxu0 %v1064_v28 }
  0x1e   :  { %988 = vmatprep.subr.bf16.mxu1 %v1065_v29 }
  0x20   :  { %949 = vmatpush3.bf16.msra.mxu0 %v1066_v30 }
  0x21   :  { %989 = vmatpush3.bf16.msra.mxu1 %v1067_v31 }
  0x23   :  { %410 = vmatmul.mubr.bf16.vlgmr.msra.gmra.mxu0 %v1068_v32 }
  0x24   :  { %475 = vmatmul.mubr.bf16.vlgmr.msra.gmra.mxu1 %v1071_v34  ;;  %417 = vmatprep.mubr.bf16.mxu0 %v1074_v36 }
  0x25   :  { %482 = vmatprep.mubr.bf16.mxu1 %v1076_v37 }
  0x26   :  { %11 = vsyncpa [#allocation3], 0  ;;  %v1084_v42 = vld [vmem:[%s1537_s1 + $0x40] ss:$16 sps:$4 sm:$0xff]   ;;  %v1085_v43 = vld [vmem:[%s1537_s1 + $0x48] ss:$16 sps:$4 sm:$0xff]  }
  0x27   :  { %v1086_v44 = vld [vmem:[%s1537_s1 + $0x64] ss:$16 sps:$4 sm:$0xff]   ;;  %v1088_v45 = vld [vmem:[%s1537_s1 + $0x6c] ss:$16 sps:$4 sm:$0xff]   ;;  %v1090_v46 = vld [vmem:[%s1537_s1 + $0x60] ss:$16 sps:$4 sm:$0xff]  }
  0x28   :  { %v1091_v47 = vld [vmem:[%s1537_s1 + $0x68] ss:$16 sps:$4 sm:$0xff]   ;;  %v1134_v48 = vmov 0   ;;  %vm507_vm0 = vcmask 261120   ;;  %vm1136_vm1 = vmmov 0   ;;  %vm869_vm10 = vcmask 8192  }
  0x29   :  { %1035 = vset.pattern.permute.xlu1 %v1134_v48  ;;  %1034 = vset.pattern.permute.xlu0 %v1134_v48  ;;  %v619_v48 = vld [vmem:[%s1538_s2 + $0x30] sm:$0xff] }
  0x2b   :  { %418 = vmatmul.mubr.bf16.gmra.mxu0 %v1078_v38 }
  0x2c   :  { %483 = vmatmul.mubr.bf16.gmra.mxu1 %v1079_v39  ;;  %425 = vmatprep.mubr.bf16.mxu0 %v1080_v40 }
  0x2d   :  { %490 = vmatprep.mubr.bf16.mxu1 %v1082_v41  ;;  %v614_v41 = vld [vmem:[%s1538_s2 + $0x8] sm:$0xff] }
  0x33   :  { %426 = vmatmul.mubr.bf16.gmra.mxu0 %v1084_v42  ;;  %v615_v42 = vld [vmem:[%s1538_s2 + $0x10] sm:$0xff] }
  0x34   :  { %491 = vmatmul.mubr.bf16.gmra.mxu1 %v1085_v43  ;;  %433 = vmatprep.mubr.bf16.mxu0 %v1086_v44  ;;  %v669_v43 = vld [vmem:[%s1539_s3] sm:$0xff] }
  0x35   :  { %498 = vmatprep.mubr.bf16.mxu1 %v1088_v45  ;;  %v613_v44 = vld [vmem:[%s1538_s2] sm:$0xff]  ;;  %v670_v45 = vld [vmem:[%s1539_s3 + $0x8] sm:$0xff] }
  0x3b   :  { %434 = vmatmul.mubr.bf16.gmra.mxu0 %v1090_v46  ;;  %v618_v46 = vld [vmem:[%s1538_s2 + $0x28] sm:$0xff] }
  0x3c   :  { %499 = vmatmul.mubr.bf16.gmra.mxu1 %v1091_v47  ;;  %v616_v47 = vld [vmem:[%s1538_s2 + $0x18] sm:$0xff] }
  0xe3   :  { %v950_v49 = vpop.f32.mrf.mxu0 }
  0xe4   :  { %v990_v50 = vpop.f32.mrf.mxu1 }
  0xe5   :  { %v951_v51 = vpop.f32.mrf.mxu0 }
  0xe6   :  { %v952_v52 = vadd.f32 %v951_v51, %v950_v49  ;;  %v991_v53 = vpop.f32.mrf.mxu1  ;;  %v671_v49 = vld [vmem:[%s1539_s3 + $0x10] sm:$0xff]  ;;  %v617_v51 = vld [vmem:[%s1538_s2 + $0x20] sm:$0xff] }
  0xe7   :  { %v992_v54 = vadd.f32 %v991_v53, %v990_v50  ;;  %v953_v55 = vpop.f32.mrf.mxu0  ;;  %v620_v50 = vld [vmem:[%s1538_s2 + $0x38] sm:$0xff] }
  0xe8   :  { %v993_v56 = vpop.f32.mrf.mxu1 }
  0xe9   :  { %v954_v57 = vpop.f32.mrf.mxu0  ;;  %v1317_v58 = vadd.f32 %v992_v54, %v952_v52  ;;  %v672_v52 = vld [vmem:[%s1539_s3 + $0x18] sm:$0xff] }
  0xea   :  { %v955_v59 = vadd.f32 %v954_v57, %v953_v55  ;;  %v994_v60 = vpop.f32.mrf.mxu1 }
  0xeb   :  { %v995_v61 = vadd.f32 %v994_v60, %v993_v56  ;;  %v956_v62 = vpop.f32.mrf.mxu0  ;;  %v508_v63 = vsel %vm507_vm0, %v1317_v58, 0.0 }
  0xec   :  { %v996_v0 = vpop.f32.mrf.mxu1  ;;  %509 = vadd.xlane.f32.xlu0 %v508_v63  ;;  %v674_v63 = vld [vmem:[%s1539_s3 + $0x28] sm:$0xff] }
  0xed   :  { %v957_v1 = vpop.f32.mrf.mxu0  ;;  %v1321_v2 = vadd.f32 %v995_v61, %v955_v59 }
  0xee   :  { %v958_v3 = vadd.f32 %v957_v1, %v956_v62  ;;  %v997_v4 = vpop.f32.mrf.mxu1  ;;  %v673_v62 = vld [vmem:[%s1539_s3 + $0x20] sm:$0xff] }
  0xef   :  { %v998_v5 = vadd.f32 %v997_v4, %v996_v0  ;;  %v959_v6 = vpop.f32.mrf.mxu0  ;;  %v511_v7 = vsel %vm507_vm0, %v1321_v2, 0.0 }
  0xf0   :  { %v999_v8 = vpop.f32.mrf.mxu1  ;;  %512 = vadd.xlane.f32.xlu0 %v511_v7 }
  0xf1   :  { %v960_v9 = vpop.f32.mrf.mxu0  ;;  %v1325_v10 = vadd.f32 %v998_v5, %v958_v3 }
  0xf2   :  { %v961_v11 = vadd.f32 %v960_v9, %v959_v6  ;;  %v1000_v12 = vpop.f32.mrf.mxu1 }
  0xf3   :  { %v1001_v13 = vadd.f32 %v1000_v12, %v999_v8  ;;  %v962_v14 = vpop.f32.mrf.mxu0  ;;  %v514_v15 = vsel %vm507_vm0, %v1325_v10, 0.0 }
  0xf4   :  { %v1002_v16 = vpop.f32.mrf.mxu1  ;;  %515 = vadd.xlane.f32.xlu1 %v514_v15 }
  0xf5   :  { %v963_v17 = vpop.f32.mrf.mxu0  ;;  %v1329_v18 = vadd.f32 %v1001_v13, %v961_v11 }
  0xf6   :  { %v964_v19 = vadd.f32 %v963_v17, %v962_v14  ;;  %v1003_v20 = vpop.f32.mrf.mxu1 }
  0xf7   :  { %v1004_v21 = vadd.f32 %v1003_v20, %v1002_v16  ;;  %v965_v22 = vpop.f32.mrf.mxu0  ;;  %v517_v23 = vsel %vm507_vm0, %v1329_v18, 0.0 }
  0xf8   :  { %v1005_v24 = vpop.f32.mrf.mxu1  ;;  %518 = vadd.xlane.f32.xlu1 %v517_v23 }
  0xf9   :  { %v966_v25 = vpop.f32.mrf.mxu0  ;;  %v1333_v26 = vadd.f32 %v1004_v21, %v964_v19 }
  0xfa   :  { %v967_v27 = vadd.f32 %v966_v25, %v965_v22  ;;  %v1006_v28 = vpop.f32.mrf.mxu1 }
  0xfb   :  { %v1007_v29 = vadd.f32 %v1006_v28, %v1005_v24  ;;  %v968_v30 = vpop.f32.mrf.mxu0  ;;  %v520_v31 = vsel %vm507_vm0, %v1333_v26, 0.0 }
  0xfc   :  { %v1008_v32 = vpop.f32.mrf.mxu1  ;;  %521 = vadd.xlane.f32.xlu0 %v520_v31 }
  0xfd   :  { %v969_v33 = vpop.f32.mrf.mxu0  ;;  %v1337_v34 = vadd.f32 %v1007_v29, %v967_v27 }
  0xfe   :  { %v970_v35 = vadd.f32 %v969_v33, %v968_v30  ;;  %v1009_v36 = vpop.f32.mrf.mxu1 }
  0xff   :  { %v1010_v37 = vadd.f32 %v1009_v36, %v1008_v32  ;;  %v523_v38 = vsel %vm507_vm0, %v1337_v34, 0.0  ;;  %v971_v53 = vpop.f32.mrf.mxu0 }
 0x100   :  { %524 = vadd.xlane.f32.xlu1 %v523_v38  ;;  %v1011_v54 = vpop.f32.mrf.mxu1 }
 0x101   :  { %v1341_v39 = vadd.f32 %v1010_v37, %v970_v35  ;;  %v972_v55 = vpop.f32.mrf.mxu0 }
 0x102   :  { %v1012_v56 = vpop.f32.mrf.mxu1  ;;  %v973_v57 = vadd.f32 %v972_v55, %v971_v53  ;;  %v786_v53 = vld [vmem:[%s1541_s5] sm:$0xff] }
 0x103   :  { %v526_v40 = vsel %vm507_vm0, %v1341_v39, 0.0  ;;  %v1013_v59 = vadd.f32 %v1012_v56, %v1011_v54 }
 0x104   :  { %527 = vadd.xlane.f32.xlu0 %v526_v40 }
 0x105   :  { %v504_v60 = vadd.f32 %v1013_v59, %v973_v57 }
 0x107   :  { %v529_v61 = vsel %vm507_vm0, %v504_v60, 0.0 }
 0x111   :  { %628 = vperm.xlu1 %1035, %v614_v41  }
 0x115   :  { %633 = vperm.xlu1 %1035, %v615_v42  }
 0x119   :  { %679 = vperm.xlu1 %1035, %v669_v43  }
 0x11a   :  { %623 = vperm.xlu0 %1034, %v613_v44  }
 0x11d   :  { %684 = vperm.xlu1 %1035, %v670_v45  }
 0x11e   :  { %648 = vperm.xlu0 %1034, %v618_v46  }
 0x121   :  { %638 = vperm.xlu1 %1035, %v616_v47  }
 0x122   :  { %653 = vperm.xlu0 %1034, %v619_v48   ;;  %v675_v48 = vld [vmem:[%s1539_s3 + $0x30] sm:$0xff] }
 0x125   :  { %689 = vperm.xlu1 %1035, %v671_v49   ;;  %v1135_v49 = vmov 0.0  }
 0x126   :  { %658 = vperm.xlu0 %1034, %v620_v50   ;;  %1019 = vmatprep.subr.mxu0 %v1135_v49  ;;  %v789_v50 = vld [vmem:[%s1541_s5 + $0x18] sm:$0xff] }
 0x127   :  { %1020 = vmatpush3.msra.mxu0 %v789_v50  ;;  %1027 = vmatprep.mubr.msk.f32.mxu0 %vm1136_vm1, %v1135_v49 }
 0x128   :  { %1021 = vmatprep.subr.mxu0 %v1135_v49 }
 0x129   :  { %643 = vperm.xlu1 %1035, %v617_v51   ;;  %v788_v51 = vld [vmem:[%s1541_s5 + $0x10] sm:$0xff] }
 0x12a   :  { %1022 = vmatpush3.msra.mxu0 %v788_v51 }
 0x12b   :  { %1023 = vmatprep.subr.mxu0 %v1135_v49 }
 0x12d   :  { %694 = vperm.xlu1 %1035, %v672_v52   ;;  %v787_v52 = vld [vmem:[%s1541_s5 + $0x8] sm:$0xff] }
 0x12e   :  { %1024 = vmatpush3.msra.mxu0 %v787_v52 }
 0x12f   :  { %1025 = vmatprep.subr.mxu0 %v1135_v49 }
 0x130   :  { %1026 = vmatpush3.msra.mxu0 %v786_v53 }
 0x151   :  { %530 = vadd.xlane.f32.xlu1 %v529_v61 }
 0x162   :  { %699 = vperm.xlu1 %1035, %v673_v62  }
 0x166   :  { %704 = vperm.xlu1 %1035, %v674_v63  }
 0x175   :  { %v510_v0 = vpop.xlane.xlu0 %509 }
 0x176   :  { %v533_v1 = vmul.f32 0.03125, %v510_v0 }
 0x178   :  { %v1389_v3 = vsub.f32 %v1317_v58, %v533_v1 }
 0x179   :  { %v513_v4 = vpop.xlane.xlu0 %512 }
 0x17a   :  { %v549_v5 = vmul.f32 %v1389_v3, %v1389_v3  ;;  %v534_v7 = vmul.f32 0.03125, %v513_v4 }
 0x17c   :  { %v557_v6 = vsel %vm507_vm0, %v549_v5, 0.0  ;;  %v1398_v12 = vsub.f32 %v1321_v2, %v534_v7 }
 0x17d   :  { %v516_v8 = vpop.xlane.xlu1 %515  ;;  %558 = vadd.xlane.f32.xlu0 %v557_v6 }
 0x17e   :  { %v535_v9 = vmul.f32 0.03125, %v516_v8  ;;  %v550_v19 = vmul.f32 %v1398_v12, %v1398_v12 }
 0x180   :  { %v1395_v11 = vsub.f32 %v1325_v10, %v535_v9  ;;  %v560_v21 = vsel %vm507_vm0, %v550_v19, 0.0 }
 0x181   :  { %v519_v13 = vpop.xlane.xlu1 %518 }
 0x182   :  { %v536_v14 = vmul.f32 0.03125, %v519_v13  ;;  %v551_v58 = vmul.f32 %v1395_v11, %v1395_v11 }
 0x184   :  { %v563_v15 = vsel %vm507_vm0, %v551_v58, 0.0  ;;  %v1404_v16 = vsub.f32 %v1329_v18, %v536_v14 }
 0x185   :  { %564 = vadd.xlane.f32.xlu0 %v563_v15  ;;  %v522_v17 = vpop.xlane.xlu0 %521 }
 0x186   :  { %v537_v10 = vmul.f32 0.03125, %v522_v17  ;;  %v552_v22 = vmul.f32 %v1404_v16, %v1404_v16 }
 0x188   :  { %v1409_v20 = vsub.f32 %v1333_v26, %v537_v10  ;;  %v566_v26 = vsel %vm507_vm0, %v552_v22, 0.0 }
 0x189   :  { %v525_v2 = vpop.xlane.xlu1 %524 }
 0x18a   :  { %v538_v23 = vmul.f32 0.03125, %v525_v2  ;;  %561 = vadd.xlane.f32.xlu1 %v560_v21  ;;  %v553_v18 = vmul.f32 %v1409_v20, %v1409_v20 }
 0x18c   :  { %v1417_v24 = vsub.f32 %v1337_v34, %v538_v23  ;;  %v569_v25 = vsel %vm507_vm0, %v553_v18, 0.0  ;;  %v676_v34 = vld [vmem:[%s1539_s3 + $0x38] sm:$0xff] }
 0x18d   :  { %570 = vadd.xlane.f32.xlu0 %v569_v25  ;;  %v528_v27 = vpop.xlane.xlu0 %527  ;;  %v1433_v35 = vpop.permute.xlu1 %628 }
 0x18e   :  { %v539_v28 = vmul.f32 0.03125, %v528_v27  ;;  %567 = vadd.xlane.f32.xlu1 %v566_v26  ;;  %v554_v29 = vmul.f32 %v1417_v24, %v1417_v24 }
 0x190   :  { %v1424_v30 = vsub.f32 %v1341_v39, %v539_v28  ;;  %v572_v31 = vsel %vm507_vm0, %v554_v29, 0.0 }
 0x191   :  { %v1435_v36 = vpop.permute.xlu1 %633 }
 0x192   :  { %573 = vadd.xlane.f32.xlu1 %v572_v31  ;;  %v555_v32 = vmul.f32 %v1424_v30, %v1424_v30 }
 0x194   :  { %v575_v33 = vsel %vm507_vm0, %v555_v32, 0.0 }
 0x195   :  { %576 = vadd.xlane.f32.xlu0 %v575_v33  ;;  %v1437_v37 = vpop.permute.xlu1 %679  ;;  %v624_v54 = vpop.permute.xlu0 %623 }
 0x199   :  { %v1439_v38 = vpop.permute.xlu1 %684  ;;  %v1469_v55 = vpop.permute.xlu0 %648 }
 0x19d   :  { %v1441_v39 = vpop.permute.xlu1 %638  ;;  %v1473_v57 = vpop.permute.xlu0 %653 }
 0x1a1   :  { %v1443_v40 = vpop.permute.xlu1 %689 }
 0x1a5   :  { %v1445_v41 = vpop.permute.xlu1 %643 }
 0x1a9   :  { %v1447_v42 = vpop.permute.xlu1 %694 }
 0x1ab   :  { %714 = vperm.xlu0 %1034, %v676_v34  }
 0x1da   :  { %v531_v43 = vpop.xlane.xlu1 %530 }
 0x1db   :  { %v540_v44 = vmul.f32 0.03125, %v531_v43 }
 0x1dd   :  { %v1449_v45 = vsub.f32 %v504_v60, %v540_v44  ;;  %v1477_v60 = vpop.permute.xlu0 %658 }
 0x1de   :  { %v1471_v56 = vpop.permute.xlu1 %699 }
 0x1df   :  { %v556_v46 = vmul.f32 %v1449_v45, %v1449_v45 }
 0x1e1   :  { %v578_v47 = vsel %vm507_vm0, %v556_v46, 0.0 }
 0x1e2   :  { %579 = vadd.xlane.f32.xlu1 %v578_v47  ;;  %v1475_v59 = vpop.permute.xlu1 %704 }
 0x1f3   :  { %709 = vperm.xlu1 %1035, %v675_v48  }
 0x206   :  { %v559_v62 = vpop.xlane.xlu0 %558 }
 0x207   :  { %v581_v0 = vmul.f32 0.03125, %v559_v62 }
 0x209   :  { %v589_v6 = vadd.f32 1e-05, %v581_v0 }
 0x20e   :  { %v565_v1 = vpop.xlane.xlu0 %564 }
 0x20f   :  { %v583_v7 = vmul.f32 0.03125, %v565_v1 }
 0x211   :  { %v591_v9 = vadd.f32 1e-05, %v583_v7 }
 0x213   :  { %v562_v61 = vpop.xlane.xlu1 %561 }
 0x214   :  { %v582_v63 = vmul.f32 0.03125, %v562_v61 }
 0x216   :  { %v590_v4 = vadd.f32 1e-05, %v582_v63  ;;  %v571_v13 = vpop.xlane.xlu0 %570 }
 0x217   :  { %v568_v5 = vpop.xlane.xlu1 %567  ;;  %v585_v15 = vmul.f32 0.03125, %v571_v13 }
 0x218   :  { %1092 = vrsqrt.f32 %v590_v4  ;;  %v584_v8 = vmul.f32 0.03125, %v568_v5 }
 0x219   :  { %1094 = vrsqrt.f32 %v589_v6  ;;  %v593_v10 = vadd.f32 1e-05, %v585_v15 }
 0x21a   :  { %v592_v14 = vadd.f32 1e-05, %v584_v8  ;;  %1096 = vrsqrt.f32 %v591_v9 }
 0x21b   :  { %v574_v58 = vpop.xlane.xlu1 %573 }
 0x21c   :  { %1098 = vrsqrt.f32 %v592_v14  ;;  %v586_v17 = vmul.f32 0.03125, %v574_v58 }
 0x21d   :  { %1100 = vrsqrt.f32 %v593_v10 }
 0x21e   :  { %v577_v19 = vpop.xlane.xlu0 %576  ;;  %v594_v2 = vadd.f32 1e-05, %v586_v17  ;;  %v753_v17 = vld [vmem:[%s1540_s4 + $0x20] sm:$0xff] }
 0x21f   :  { %v587_v21 = vmul.f32 0.03125, %v577_v19 }
 0x220   :  { %1102 = vrsqrt.f32 %v594_v2  ;;  %v754_v2 = vld [vmem:[%s1540_s4 + $0x28] sm:$0xff] }
 0x221   :  { %v595_v25 = vadd.f32 1e-05, %v587_v21 }
 0x223   :  { %1104 = vrsqrt.f32 %v595_v25  ;;  %v755_v25 = vld [vmem:[%s1540_s4 + $0x30] sm:$0xff] }
 0x225   :  { %v1093_v22 = vpop.eup %1092 }
 0x226   :  { %v1095_v23 = vpop.eup %1094  ;;  %v606_v18 = vmul.f32 %v1093_v22, %v1398_v12 }
 0x227   :  { %v605_v27 = vmul.f32 %v1095_v23, %v1389_v3  ;;  %v1097_v26 = vpop.eup %1096 }
 0x228   :  { %v662_v28 = vmul.f32 %v1433_v35, %v606_v18  ;;  %v607_v32 = vmul.f32 %v1097_v26, %v1395_v11 }
 0x229   :  { %v1099_v29 = vpop.eup %1098  ;;  %v661_v31 = vmul.f32 %v624_v54, %v605_v27 }
 0x22a   :  { %v718_v33 = vadd.f32 %v1439_v38, %v662_v28  ;;  %v608_v34 = vmul.f32 %v1099_v29, %v1404_v16  ;;  %v663_v12 = vmul.f32 %v1435_v36, %v607_v32  ;;  %v1101_v44 = vpop.eup %1100  ;;  %v750_v36 = vld [vmem:[%s1540_s4 + $0x8] sm:$0xff] }
 0x22b   :  { %v717_v43 = vadd.f32 %v1437_v37, %v661_v31  ;;  %v609_v49 = vmul.f32 %v1101_v44, %v1409_v20  ;;  %v749_v20 = vld [vmem:[%s1540_s4] sm:$0xff]  ;;  %v715_v31 = vpop.permute.xlu0 %714 }
 0x22c   :  { %v734_v46 = vmul.f32 0.2, %v718_v33  ;;  %v664_v3 = vmul.f32 %v1441_v39, %v608_v34  ;;  %vm726_vm2 = vcmp.ge.f32.partialorder %v718_v33, 0.0  ;;  %v719_v48 = vadd.f32 %v1443_v40, %v663_v12 }
 0x22d   :  { %v1103_v47 = vpop.eup %1102  ;;  %v733_v35 = vmul.f32 0.2, %v717_v43  ;;  %vm725_vm3 = vcmp.ge.f32.partialorder %v717_v43, 0.0  ;;  %v665_v52 = vmul.f32 %v1445_v41, %v609_v49  ;;  %v751_v41 = vld [vmem:[%s1540_s4 + $0x10] sm:$0xff] }
 0x22e   :  { %v720_v38 = vadd.f32 %v1447_v42, %v664_v3  ;;  %v610_v16 = vmul.f32 %v1103_v47, %v1417_v24  ;;  %v742_v50 = vsel %vm726_vm2, %v718_v33, %v734_v46  ;;  %v735_v51 = vmul.f32 0.2, %v719_v48 }
 0x22f   :  { %v741_v40 = vsel %vm725_vm3, %v717_v43, %v733_v35  ;;  %v758_v54 = vmul.f32 %v750_v36, %v742_v50  ;;  %vm727_vm4 = vcmp.ge.f32.partialorder %v719_v48, 0.0  ;;  %v721_v63 = vadd.f32 %v1471_v56, %v665_v52 }
 0x230   :  { %v1105_v39 = vpop.eup %1104  ;;  %v666_v24 = vmul.f32 %v1469_v55, %v610_v16  ;;  %v736_v42 = vmul.f32 0.2, %v720_v38  ;;  %vm728_vm5 = vcmp.ge.f32.partialorder %v720_v38, 0.0  ;;  %v757_v62 = vmul.f32 %v749_v20, %v741_v40  ;;  %v752_v55 = vld [vmem:[%s1540_s4 + $0x18] sm:$0xff] }
 0x231   :  { %v611_v61 = vmul.f32 %v1105_v39, %v1424_v30  ;;  %v743_v0 = vsel %vm727_vm4, %v719_v48, %v735_v51  ;;  %v766_v1 = vsel %vm507_vm0, %v758_v54, 0.0  ;;  %v737_v9 = vmul.f32 0.2, %v721_v63 }
 0x232   :  { %v744_v5 = vsel %vm728_vm5, %v720_v38, %v736_v42  ;;  %v722_v30 = vadd.f32 %v1475_v59, %v666_v24  ;;  %v759_v7 = vmul.f32 %v751_v41, %v743_v0  ;;  %v765_v56 = vsel %vm507_vm0, %v757_v62, 0.0 }
 0x233   :  { %v667_v6 = vmul.f32 %v1473_v57, %v611_v61  ;;  %v767_v13 = vadd.f32 %v766_v1, %v765_v56  ;;  %v760_v14 = vmul.f32 %v752_v55, %v744_v5  ;;  %vm729_vm6 = vcmp.ge.f32.partialorder %v721_v63, 0.0 }
 0x234   :  { %v738_v58 = vmul.f32 0.2, %v722_v30  ;;  %vm730_vm7 = vcmp.ge.f32.partialorder %v722_v30, 0.0  ;;  %v768_v15 = vsel %vm507_vm0, %v759_v7, 0.0  ;;  %v745_v57 = vsel %vm729_vm6, %v721_v63, %v737_v9 }
 0x235   :  { %v769_v10 = vadd.f32 %v768_v15, %v767_v13  ;;  %v770_v59 = vsel %vm507_vm0, %v760_v14, 0.0  ;;  %v761_v23 = vmul.f32 %v753_v17, %v745_v57 }
 0x236   :  { %v746_v21 = vsel %vm730_vm7, %v722_v30, %v738_v58 }
 0x237   :  { %v771_v26 = vadd.f32 %v770_v59, %v769_v10  ;;  %v762_v28 = vmul.f32 %v754_v2, %v746_v21  ;;  %v772_v33 = vsel %vm507_vm0, %v761_v23, 0.0 }
 0x239   :  { %v773_v43 = vadd.f32 %v772_v33, %v771_v26  ;;  %v774_v12 = vsel %vm507_vm0, %v762_v28, 0.0 }
 0x23b   :  { %v775_v47 = vadd.f32 %v774_v12, %v773_v43 }
 0x26b   :  { %v580_v11 = vpop.xlane.xlu1 %579 }
 0x26c   :  { %v588_v37 = vmul.f32 0.03125, %v580_v11 }
 0x26e   :  { %v596_v53 = vadd.f32 1e-05, %v588_v37 }
 0x26f   :  { %v710_v4 = vpop.permute.xlu1 %709 }
 0x270   :  { %1106 = vrsqrt.f32 %v596_v53  ;;  %v723_v8 = vadd.f32 %v710_v4, %v667_v6 }
 0x272   :  { %v739_v19 = vmul.f32 0.2, %v723_v8  ;;  %vm731_vm8 = vcmp.ge.f32.partialorder %v723_v8, 0.0 }
 0x274   :  { %v747_v27 = vsel %vm731_vm8, %v723_v8, %v739_v19 }
 0x275   :  { %v763_v32 = vmul.f32 %v755_v25, %v747_v27 }
 0x277   :  { %v776_v46 = vsel %vm507_vm0, %v763_v32, 0.0 }
 0x27d   :  { %v1107_v22 = vpop.eup %1106 }
 0x27e   :  { %v612_v18 = vmul.f32 %v1107_v22, %v1449_v45  ;;  %v756_v45 = vld [vmem:[%s1540_s4 + $0x38] sm:$0xff]  ;;  %s1137_s4 = smov [#allocation2]  }
 0x27f   :  { %s877_s1 = sshll.u32 %s1137_s4, 4  ;;  %s878_s1 = int_to_ptr.vmem [resolvable:$true] %s877_s1 }
 0x280   :  { %v668_v29 = vmul.f32 %v1477_v60, %v612_v18  ;;  %v777_v60 = vadd.f32 %v776_v46, %v775_v47  ;;  %s1112_s20 = scalar_lea.vmem %s878_s1, 16  ;;  %s1116_s0 = scalar_lea.vmem %s878_s1, 32 }
 0x281   :  { %p1113_p0 = scmp.ne.s32.totalorder %s878_s1, %s1112_s20  ;;  %p1117_p1 = scmp.lt.s32.totalorder %s878_s1, %s878_s1 }
 0x282   :  { %v724_v34 = vadd.f32 %v715_v31, %v668_v29  ;;  %p1118_p2 = scmp.lt.s32.totalorder %s1116_s0, %s1112_s20 }
 0x284   :  { %vm732_vm9 = vcmp.ge.f32.partialorder %v724_v34, 0.0  ;;  %v740_v44 = vmul.f32 0.2, %v724_v34  ;;  %p1119_p3 = por %p1118_p2, %p1117_p1 }
 0x286   :  { %v748_v3 = vsel %vm732_vm9, %v724_v34, %v740_v44  ;;  %p1120_p4 = pnand %p1119_p3, %p1113_p0 }
 0x287   :  { %v764_v35 = vmul.f32 %v756_v45, %v748_v3 }
 0x289   :  { %v778_v48 = vsel %vm507_vm0, %v764_v35, 0.0 }
 0x28a   :  { %v779_v49 = vadd.f32 %v778_v48, %v777_v60 }
 0x28c   :  { %v780_v11 = vrot.slane %v779_v49, 4 }
 0x28e   :  { %v781_v38 = vadd.f32 %v780_v11, %v779_v49 }
 0x290   :  { %v782_v16 = vrot.slane %v781_v38, 2 }
 0x292   :  { %v783_v37 = vadd.f32 %v782_v16, %v781_v38 }
 0x294   :  { %v784_v50 = vrot.slane %v783_v37, 1 }
 0x296   :  { %v785_v36 = vadd.f32 %v784_v50, %v783_v37 }
 0x298   :  { %1028 = vmatmul.mubr.msk.f32.vlgmr.msra.gmra.mxu0 %vm507_vm0, %v785_v36 }
 0x358   :  { %v859_v39 = vpop.f32.mrf.mxu0 }
 0x359   :  { %v863_v51 = vsub.f32 0.0, %v859_v39 }
 0x35a   :  { %v1029_v52 = vpop.f32.mrf.mxu0 }
 0x35b   :  { %v864_v53 = vmul.f32 1.442695, %v863_v51 }
 0x35d   :  { %1108 = vpow2.f32 %v864_v53 }
 0x36a   :  { %v1109_v20 = vpop.eup %1108 }
 0x36b   :  { %v866_v40 = vadd.f32 1.0, %v1109_v20 }
 0x36d   :  { %1110 = vrcp.f32 %v866_v40 }
 0x37a   :  { %v1111_v54 = vpop.eup %1110 }
 0x37b   :  { %870 = vst.msk [vmem:[#allocation2] sm:$0x1] %vm869_vm10, %v1111_v54 }
 0x37c   :  { %1123 = shalt.err (!%p1120_p4)
}
 0x37d   :  { %880 = dma.vmem_to_hbm [thread:$0]  %s878_s1, 16, %s1542_s6, [#allocation3]  }
 0x37e   :  { %1132 = dma.done.wait [#allocation3], 16  }
 0x37f   :  { %1133 = vsyncadd [#allocation3], 4294967280 }
 0x380   :  { %884 = vsyncpa [#allocation3], 1 }

</bundles_post_ra>
